<compile_context>
chip_gen: v5e
topology: v5e:2x2
jax: 0.10.0
libtpu: 0.0.40
codegen_flags: <defaults>
</compile_context>

<pallas_src>
import functools
import math

import jax
import jax.numpy as jnp
from jax.experimental import pallas as pl
from jax.experimental.pallas import tpu as pltpu


# ----------------------------- Pallas kernel --------------------------------
def transformer_block_kernel(
    x_ref,        # (Bb*S, E)
    mask_ref,     # (Bb, 1, S) float32, 1.0 = padded key
    wqkv_ref,     # (E, 3E)   q columns pre-scaled by 1/sqrt(Dh)
    wo_ref,       # (E, E)
    w1_ref,       # (E, F)
    w2_ref,       # (F, E)
    vecs_ref,     # (8, W) rows: ln1w, ln1b, ln2w, ln2b, bo, b2, bqkv, b1 (zero-padded)
    out_ref,      # (Bb*S, E)
    *,
    num_heads: int,
    batch_per_block: int,
):
    eps = 1e-5
    x = x_ref[...].astype(jnp.float32)          # (R, E), R = Bb*S
    R, E = x.shape
    S = R // batch_per_block
    F = w1_ref.shape[1]
    Dh = E // num_heads

    vecs = vecs_ref[...]
    ln1w, ln1b = vecs[0, :E], vecs[1, :E]
    ln2w, ln2b = vecs[2, :E], vecs[3, :E]
    bo, b2 = vecs[4, :E], vecs[5, :E]
    bqkv = vecs[6, :3 * E]
    b1 = vecs[7, :F]

    # ---- LayerNorm 1 (all Bb*S rows at once) ----
    mu = jnp.mean(x, axis=-1, keepdims=True)
    var = jnp.mean((x - mu) ** 2, axis=-1, keepdims=True)
    xn = (x - mu) * jax.lax.rsqrt(var + eps) * ln1w + ln1b            # (R, E)

    # ---- QKV projection (1/sqrt(Dh) already folded into q weights/bias) ----
    qkv = jnp.dot(xn, wqkv_ref[...], preferred_element_type=jnp.float32) + bqkv
    q = qkv[:, 0 * E:1 * E]
    k = qkv[:, 1 * E:2 * E]
    v = qkv[:, 2 * E:3 * E]

    # ---- Multi-head self-attention, per batch item in the block ----
    # TODO(synk): flash-style kv tiling needed at realistic S; full (S,S) f32 scores are
    # fine at S=8.
    # TODO(synk): per-head (H,S,Dh) relayout + batched dot_general deferred; at Dh=8 the
    # lane relayout costs more than the 8 tiny slice-matmuls it replaces.
    blocks = []
    for b in range(batch_per_block):            # unrolled (Bb is 1 or B, tiny)
        # TODO(synk): rows whose keys are ALL padded give a uniform softmax here, whereas
        # PyTorch MultiheadAttention returns NaN for such rows.
        bias = mask_ref[b] * jnp.float32(-1e30)                       # (1, S)
        r0 = b * S
        qb = q[r0:r0 + S]
        kb = k[r0:r0 + S]
        vb = v[r0:r0 + S]
        heads = []
        for h in range(num_heads):              # unrolled; results stay in vregs
            lo, hi = h * Dh, (h + 1) * Dh
            s = jnp.dot(qb[:, lo:hi], kb[:, lo:hi].T,
                        preferred_element_type=jnp.float32) + bias    # (S, S)
            s_max = jnp.max(s, axis=-1, keepdims=True)
            p = jnp.exp(s - s_max)
            p = p * pl.reciprocal(jnp.sum(p, axis=-1, keepdims=True), approx=True)
            heads.append(jnp.dot(p, vb[:, lo:hi], preferred_element_type=jnp.float32))
        blocks.append(jnp.concatenate(heads, axis=-1))                # (S, E)
    attn = blocks[0] if batch_per_block == 1 else jnp.concatenate(blocks, axis=0)

    attn = jnp.dot(attn, wo_ref[...], preferred_element_type=jnp.float32) + bo

    # ---- residual 1 (dropout == identity at inference) + LayerNorm 2 ----
    x1 = xn + attn
    mu2 = jnp.mean(x1, axis=-1, keepdims=True)
    var2 = jnp.mean((x1 - mu2) ** 2, axis=-1, keepdims=True)
    x2 = (x1 - mu2) * jax.lax.rsqrt(var2 + eps) * ln2w + ln2b

    # ---- FFN: Linear -> ReLU -> Linear ----
    # TODO(synk): cast matmul operands/weights to bf16 at realistic E/F (noise at E=32).
    h1 = jnp.maximum(
        jnp.dot(x2, w1_ref[...], preferred_element_type=jnp.float32) + b1, 0.0)
    ffn = jnp.dot(h1, w2_ref[...], preferred_element_type=jnp.float32) + b2

    # ---- residual 2 ----
    # TODO(synk): revisit lane-dense output slab once E >= 128 (E=32 stores are masked).
    out_ref[...] = (x2 + ffn).astype(out_ref.dtype)


# ------------------------------ Wrapper --------------------------------------
def _single_tensorcore_chip() -> bool:
    """True for single-TensorCore chips (v5e/v6e) -> fold batch into one grid step.
    On v7x (2 TCs/chip) keep the parallel per-batch grid axis instead."""
    try:
        kind = jax.devices()[0].device_kind.lower()
    except Exception:
        return True
    return not ("v7" in kind or "7x" in kind)


def transformer_block(x, mask, params, *, num_heads, fold_batch=None):
    """x: (B, S, E) float32; mask: (B, S) bool (True = padded key)."""
    B, S, E = x.shape
    F = params["w1"].shape[1]
    Dh = E // num_heads
    scale = 1.0 / math.sqrt(Dh)

    if fold_batch is None:
        fold_batch = _single_tensorcore_chip()
    Bb = B if fold_batch else 1                 # batch items per grid step
    grid = (B // Bb,)

    # ---- one-time param transforms (would live at param-build time in a real model) ----
    wqkv = params["wqkv"].at[:, :E].multiply(scale)            # fold q-scale into weights
    bqkv = params["bqkv"].reshape(1, 3 * E).at[:, :E].multiply(scale)
    W = ((max(3 * E, F) + 127) // 128) * 128                   # lane-aligned slab width

    def row(v, width):
        v = v.reshape(1, width)
        return jnp.pad(v, ((0, 0), (0, W - width)))

    vecs = jnp.concatenate(
        [row(params["ln1w"], E), row(params["ln1b"], E),
         row(params["ln2w"], E), row(params["ln2b"], E),
         row(params["bo"], E), row(params["b2"], E),
         row(bqkv, 3 * E), row(params["b1"], F)], axis=0)      # (8, W)

    x2d = x.reshape(B * S, E)                                  # 2-D slab: no in-kernel reshape
    mask_f = mask.astype(jnp.float32).reshape(B, 1, S)

    kernel = functools.partial(transformer_block_kernel,
                               num_heads=num_heads, batch_per_block=Bb)

    def build(const_kwargs):
        def const(shape):
            return pl.BlockSpec(shape, lambda b: (0,) * len(shape), **const_kwargs)
        return pl.pallas_call(
            kernel,
            out_shape=jax.ShapeDtypeStruct((B * S, E), x.dtype),
            grid=grid,
            in_specs=[
                pl.BlockSpec((Bb * S, E), lambda b: (b, 0)),    # x rows
                pl.BlockSpec((Bb, 1, S), lambda b: (b, 0, 0)),  # key-padding mask
                const((E, 3 * E)),                              # wqkv (q-scaled)
                const((E, E)),                                  # wo
                const((E, F)),                                  # w1
                const((F, E)),                                  # w2
                const((8, W)),                                  # packed ln/bias vectors
            ],
            out_specs=pl.BlockSpec((Bb * S, E), lambda b: (b, 0)),
            compiler_params=pltpu.CompilerParams(
                dimension_semantics=("parallel",),              # batch items independent
                vmem_limit_bytes=32 * 1024 * 1024),
        )

    args = (x2d, mask_f, wqkv, params["wo"], params["w1"], params["w2"], vecs)
    try:
        # Constant-index weights: single-buffered (block index never changes, so double
        # buffering only doubles VMEM residency at realistic E/F).
        out2d = build(dict(pipeline_mode=pl.Buffered(1)))(*args)
    except Exception:
        out2d = build({})(*args)                # fall back if Buffered(1) is unsupported
    return out2d.reshape(B, S, E)


# --------------------------- Pure-JAX reference -------------------------------
def reference(x, mask, params, *, num_heads):
    eps = 1e-5
    B, S, E = x.shape
    Dh = E // num_heads

    def ln(z, w, b):
        mu = jnp.mean(z, axis=-1, keepdims=True)
        var = jnp.mean((z - mu) ** 2, axis=-1, keepdims=True)
        return (z - mu) / jnp.sqrt(var + eps) * w + b

    xn = ln(x, params["ln1w"][0], params["ln1b"][0])
    qkv = xn @ params["wqkv"] + params["bqkv"][0]
    q, k, v = jnp.split(qkv, 3, axis=-1)
    q = q.reshape(B, S, num_heads, Dh).transpose(0, 2, 1, 3) / math.sqrt(Dh)
    k = k.reshape(B, S, num_heads, Dh).transpose(0, 2, 1, 3)
    v = v.reshape(B, S, num_heads, Dh).transpose(0, 2, 1, 3)
    s = jnp.einsum("bhqd,bhkd->bhqk", q, k)
    s = jnp.where(mask[:, None, None, :], -1e30, s)
    p = jax.nn.softmax(s, axis=-1)
    attn = jnp.einsum("bhqk,bhkd->bhqd", p, v).transpose(0, 2, 1, 3).reshape(B, S, E)
    attn = attn @ params["wo"] + params["bo"][0]
    x1 = xn + attn
    x2 = ln(x1, params["ln2w"][0], params["ln2b"][0])
    ffn = jnp.maximum(x2 @ params["w1"] + params["b1"][0], 0.0) @ params["w2"] + params["b2"][0]
    return x2 + ffn


# ---------------------------------- main --------------------------------------
if __name__ == "__main__":
    B, S, E, H, F = 2, 8, 32, 4, 64

    key = jax.random.PRNGKey(0)
    ks = jax.random.split(key, 14)
    scale = 0.05
    params = {
        "wqkv": scale * jax.random.normal(ks[0], (E, 3 * E), jnp.float32),
        "bqkv": scale * jax.random.normal(ks[1], (1, 3 * E), jnp.float32),
        "wo":   scale * jax.random.normal(ks[2], (E, E), jnp.float32),
        "bo":   scale * jax.random.normal(ks[3], (1, E), jnp.float32),
        "ln1w": jnp.ones((1, E), jnp.float32) + 0.1 * jax.random.normal(ks[4], (1, E)),
        "ln1b": 0.1 * jax.random.normal(ks[5], (1, E), jnp.float32),
        "ln2w": jnp.ones((1, E), jnp.float32) + 0.1 * jax.random.normal(ks[6], (1, E)),
        "ln2b": 0.1 * jax.random.normal(ks[7], (1, E), jnp.float32),
        "w1":   scale * jax.random.normal(ks[8], (E, F), jnp.float32),
        "b1":   scale * jax.random.normal(ks[9], (1, F), jnp.float32),
        "w2":   scale * jax.random.normal(ks[10], (F, E), jnp.float32),
        "b2":   scale * jax.random.normal(ks[11], (1, E), jnp.float32),
    }

    x = jax.random.normal(ks[12], (B, S, E), jnp.float32)
    # key_padding_mask: True = padded. Batch 0 pads last 2 keys, batch 1 pads none.
    mask = jnp.zeros((B, S), jnp.bool_).at[0, -2:].set(True)

    out = transformer_block(x, mask, params, num_heads=H)
    out = jax.block_until_ready(out)

    ref = reference(x, mask, params, num_heads=H)
    assert out.shape == (B, S, E)
    assert jnp.all(jnp.isfinite(out))
    # Tolerance accommodates the approximate (EUP) reciprocal in the softmax normalizer.
    assert jnp.allclose(out, ref, atol=1e-3, rtol=1e-3), (
        f"max abs diff {jnp.max(jnp.abs(out - ref))}")

    print("KERNEL_OK")
</pallas_src>

<mosaic_0001>
module attributes {stable_mosaic.version = 11 : i64} {
  func.func @transformer_block_kernel(%arg0: i32, %arg1: memref<16x32xf32, #tpu.memory_space<vmem>>, %arg2: memref<2x1x8xf32, #tpu.memory_space<vmem>>, %arg3: memref<32x96xf32, #tpu.memory_space<vmem>>, %arg4: memref<32x32xf32, #tpu.memory_space<vmem>>, %arg5: memref<32x64xf32, #tpu.memory_space<vmem>>, %arg6: memref<64x32xf32, #tpu.memory_space<vmem>>, %arg7: memref<8x128xf32, #tpu.memory_space<vmem>>, %arg8: memref<16x32xf32, #tpu.memory_space<vmem>>) attributes {dimension_semantics = [#tpu.dimension_semantics<parallel>], iteration_bounds = array<i64: 1>, scalar_prefetch = 0 : i64, scratch_operands = 0 : i64, tpu.core_type = #tpu.core_type<tc>, window_params = [{transform_indices = @transform_0, window_bounds = array<i64: 16, 32>}, {transform_indices = @transform_1, window_bounds = array<i64: 2, 1, 8>}, {pipeline_mode = #tpu.pipeline_mode<synchronous>, transform_indices = @transform_2, window_bounds = array<i64: 32, 96>}, {pipeline_mode = #tpu.pipeline_mode<synchronous>, transform_indices = @transform_3, window_bounds = array<i64: 32, 32>}, {pipeline_mode = #tpu.pipeline_mode<synchronous>, transform_indices = @transform_4, window_bounds = array<i64: 32, 64>}, {pipeline_mode = #tpu.pipeline_mode<synchronous>, transform_indices = @transform_5, window_bounds = array<i64: 64, 32>}, {pipeline_mode = #tpu.pipeline_mode<synchronous>, transform_indices = @transform_6, window_bounds = array<i64: 8, 128>}, {transform_indices = @transform_7, window_bounds = array<i64: 16, 32>}]} {
    %c0 = arith.constant 0 : index
    %c0_0 = arith.constant 0 : index
    %0 = vector.load %arg1[%c0, %c0_0] : memref<16x32xf32, #tpu.memory_space<vmem>>, vector<16x32xf32>
    %c0_1 = arith.constant 0 : index
    %c0_2 = arith.constant 0 : index
    %1 = vector.load %arg7[%c0_1, %c0_2] : memref<8x128xf32, #tpu.memory_space<vmem>>, vector<8x128xf32>
    %2 = vector.extract_strided_slice %1 {offsets = [0, 0], sizes = [1, 32], strides = [1, 1]} : vector<8x128xf32> to vector<1x32xf32>
    %3 = vector.shape_cast %2 : vector<1x32xf32> to vector<32xf32>
    %4 = vector.extract_strided_slice %1 {offsets = [1, 0], sizes = [1, 32], strides = [1, 1]} : vector<8x128xf32> to vector<1x32xf32>
    %5 = vector.shape_cast %4 : vector<1x32xf32> to vector<32xf32>
    %6 = vector.extract_strided_slice %1 {offsets = [2, 0], sizes = [1, 32], strides = [1, 1]} : vector<8x128xf32> to vector<1x32xf32>
    %7 = vector.shape_cast %6 : vector<1x32xf32> to vector<32xf32>
    %8 = vector.extract_strided_slice %1 {offsets = [3, 0], sizes = [1, 32], strides = [1, 1]} : vector<8x128xf32> to vector<1x32xf32>
    %9 = vector.shape_cast %8 : vector<1x32xf32> to vector<32xf32>
    %10 = vector.extract_strided_slice %1 {offsets = [4, 0], sizes = [1, 32], strides = [1, 1]} : vector<8x128xf32> to vector<1x32xf32>
    %11 = vector.shape_cast %10 : vector<1x32xf32> to vector<32xf32>
    %12 = vector.extract_strided_slice %1 {offsets = [5, 0], sizes = [1, 32], strides = [1, 1]} : vector<8x128xf32> to vector<1x32xf32>
    %13 = vector.shape_cast %12 : vector<1x32xf32> to vector<32xf32>
    %14 = vector.extract_strided_slice %1 {offsets = [6, 0], sizes = [1, 96], strides = [1, 1]} : vector<8x128xf32> to vector<1x96xf32>
    %15 = vector.shape_cast %14 : vector<1x96xf32> to vector<96xf32>
    %16 = vector.extract_strided_slice %1 {offsets = [7, 0], sizes = [1, 64], strides = [1, 1]} : vector<8x128xf32> to vector<1x64xf32>
    %17 = vector.shape_cast %16 : vector<1x64xf32> to vector<64xf32>
    %cst = arith.constant dense<0.000000e+00> : vector<16xf32>
    %18 = vector.multi_reduction <add>, %0, %cst [1] : vector<16x32xf32> to vector<16xf32>
    %19 = vector.shape_cast %18 : vector<16xf32> to vector<16x1xf32>
    %cst_3 = arith.constant 3.200000e+01 : f32
    %20 = vector.broadcast %cst_3 : f32 to vector<16x1xf32>
    %21 = arith.divf %19, %20 : vector<16x1xf32>
    %22 = vector.broadcast %21 : vector<16x1xf32> to vector<16x32xf32>
    %23 = arith.subf %0, %22 : vector<16x32xf32>
    %24 = arith.mulf %23, %23 : vector<16x32xf32>
    %cst_4 = arith.constant dense<0.000000e+00> : vector<16xf32>
    %25 = vector.multi_reduction <add>, %24, %cst_4 [1] : vector<16x32xf32> to vector<16xf32>
    %26 = vector.shape_cast %25 : vector<16xf32> to vector<16x1xf32>
    %cst_5 = arith.constant 3.200000e+01 : f32
    %27 = vector.broadcast %cst_5 : f32 to vector<16x1xf32>
    %28 = arith.divf %26, %27 : vector<16x1xf32>
    %29 = vector.broadcast %21 : vector<16x1xf32> to vector<16x32xf32>
    %30 = arith.subf %0, %29 : vector<16x32xf32>
    %cst_6 = arith.constant 9.99999974E-6 : f32
    %31 = vector.broadcast %cst_6 : f32 to vector<16x1xf32>
    %32 = arith.addf %28, %31 : vector<16x1xf32>
    %33 = math.rsqrt %32 : vector<16x1xf32>
    %34 = vector.broadcast %33 : vector<16x1xf32> to vector<16x32xf32>
    %35 = arith.mulf %30, %34 : vector<16x32xf32>
    %36 = vector.shape_cast %3 : vector<32xf32> to vector<1x32xf32>
    %37 = vector.broadcast %36 : vector<1x32xf32> to vector<16x32xf32>
    %38 = arith.mulf %35, %37 : vector<16x32xf32>
    %39 = vector.shape_cast %5 : vector<32xf32> to vector<1x32xf32>
    %40 = vector.broadcast %39 : vector<1x32xf32> to vector<16x32xf32>
    %41 = arith.addf %38, %40 : vector<16x32xf32>
    %c0_7 = arith.constant 0 : index
    %c0_8 = arith.constant 0 : index
    %42 = vector.load %arg3[%c0_7, %c0_8] : memref<32x96xf32, #tpu.memory_space<vmem>>, vector<32x96xf32>
    %cst_9 = arith.constant dense<0.000000e+00> : vector<16x96xf32>
    %43 = tpu.matmul %41, %42, %cst_9 {dimension_numbers = #tpu.dot_dimension_numbers<[1], [0], [0], [1], [0, 0, 1, 1], [], []>} : vector<16x32xf32>, vector<32x96xf32>, vector<16x96xf32> -> vector<16x96xf32>
    %44 = vector.shape_cast %15 : vector<96xf32> to vector<1x96xf32>
    %45 = vector.broadcast %44 : vector<1x96xf32> to vector<16x96xf32>
    %46 = arith.addf %43, %45 : vector<16x96xf32>
    %47 = vector.extract_strided_slice %46 {offsets = [0, 0], sizes = [16, 32], strides = [1, 1]} : vector<16x96xf32> to vector<16x32xf32>
    %48 = vector.extract_strided_slice %46 {offsets = [0, 32], sizes = [16, 32], strides = [1, 1]} : vector<16x96xf32> to vector<16x32xf32>
    %49 = vector.extract_strided_slice %46 {offsets = [0, 64], sizes = [16, 32], strides = [1, 1]} : vector<16x96xf32> to vector<16x32xf32>
    %c0_10 = arith.constant 0 : index
    %c0_11 = arith.constant 0 : index
    %c0_12 = arith.constant 0 : index
    %50 = vector.load %arg2[%c0_10, %c0_11, %c0_12] : memref<2x1x8xf32, #tpu.memory_space<vmem>>, vector<1x1x8xf32>
    %51 = vector.shape_cast %50 : vector<1x1x8xf32> to vector<1x8xf32>
    %cst_13 = arith.constant -1.000000e+30 : f32
    %52 = vector.broadcast %cst_13 : f32 to vector<1x8xf32>
    %53 = arith.mulf %51, %52 : vector<1x8xf32>
    %54 = vector.extract_strided_slice %47 {offsets = [0, 0], sizes = [8, 32], strides = [1, 1]} : vector<16x32xf32> to vector<8x32xf32>
    %55 = vector.extract_strided_slice %48 {offsets = [0, 0], sizes = [8, 32], strides = [1, 1]} : vector<16x32xf32> to vector<8x32xf32>
    %56 = vector.extract_strided_slice %49 {offsets = [0, 0], sizes = [8, 32], strides = [1, 1]} : vector<16x32xf32> to vector<8x32xf32>
    %57 = vector.extract_strided_slice %54 {offsets = [0, 0], sizes = [8, 8], strides = [1, 1]} : vector<8x32xf32> to vector<8x8xf32>
    %58 = vector.extract_strided_slice %55 {offsets = [0, 0], sizes = [8, 8], strides = [1, 1]} : vector<8x32xf32> to vector<8x8xf32>
    %59 = tpu.transpose %58, [1, 0] : vector<8x8xf32> -> vector<8x8xf32>
    %cst_14 = arith.constant dense<0.000000e+00> : vector<8x8xf32>
    %60 = tpu.matmul %57, %59, %cst_14 {dimension_numbers = #tpu.dot_dimension_numbers<[1], [0], [0], [1], [0, 0, 1, 1], [], []>} : vector<8x8xf32>, vector<8x8xf32>, vector<8x8xf32> -> vector<8x8xf32>
    %61 = vector.broadcast %53 : vector<1x8xf32> to vector<8x8xf32>
    %62 = arith.addf %60, %61 : vector<8x8xf32>
    %cst_15 = arith.constant dense<0xFF800000> : vector<8xf32>
    %63 = vector.multi_reduction <maximumf>, %62, %cst_15 [1] : vector<8x8xf32> to vector<8xf32>
    %64 = vector.shape_cast %63 : vector<8xf32> to vector<8x1xf32>
    %65 = vector.broadcast %64 : vector<8x1xf32> to vector<8x8xf32>
    %66 = arith.subf %62, %65 : vector<8x8xf32>
    %67 = math.exp %66 : vector<8x8xf32>
    %cst_16 = arith.constant dense<0.000000e+00> : vector<8xf32>
    %68 = vector.multi_reduction <add>, %67, %cst_16 [1] : vector<8x8xf32> to vector<8xf32>
    %69 = vector.shape_cast %68 : vector<8xf32> to vector<8x1xf32>
    %70 = tpu.reciprocal %69 {approx = true} : vector<8x1xf32> -> vector<8x1xf32>
    %71 = vector.broadcast %70 : vector<8x1xf32> to vector<8x8xf32>
    %72 = arith.mulf %67, %71 : vector<8x8xf32>
    %73 = vector.extract_strided_slice %56 {offsets = [0, 0], sizes = [8, 8], strides = [1, 1]} : vector<8x32xf32> to vector<8x8xf32>
    %cst_17 = arith.constant dense<0.000000e+00> : vector<8x8xf32>
    %74 = tpu.matmul %72, %73, %cst_17 {dimension_numbers = #tpu.dot_dimension_numbers<[1], [0], [0], [1], [0, 0, 1, 1], [], []>} : vector<8x8xf32>, vector<8x8xf32>, vector<8x8xf32> -> vector<8x8xf32>
    %75 = vector.extract_strided_slice %54 {offsets = [0, 8], sizes = [8, 8], strides = [1, 1]} : vector<8x32xf32> to vector<8x8xf32>
    %76 = vector.extract_strided_slice %55 {offsets = [0, 8], sizes = [8, 8], strides = [1, 1]} : vector<8x32xf32> to vector<8x8xf32>
    %77 = tpu.transpose %76, [1, 0] : vector<8x8xf32> -> vector<8x8xf32>
    %cst_18 = arith.constant dense<0.000000e+00> : vector<8x8xf32>
    %78 = tpu.matmul %75, %77, %cst_18 {dimension_numbers = #tpu.dot_dimension_numbers<[1], [0], [0], [1], [0, 0, 1, 1], [], []>} : vector<8x8xf32>, vector<8x8xf32>, vector<8x8xf32> -> vector<8x8xf32>
    %79 = vector.broadcast %53 : vector<1x8xf32> to vector<8x8xf32>
    %80 = arith.addf %78, %79 : vector<8x8xf32>
    %cst_19 = arith.constant dense<0xFF800000> : vector<8xf32>
    %81 = vector.multi_reduction <maximumf>, %80, %cst_19 [1] : vector<8x8xf32> to vector<8xf32>
    %82 = vector.shape_cast %81 : vector<8xf32> to vector<8x1xf32>
    %83 = vector.broadcast %82 : vector<8x1xf32> to vector<8x8xf32>
    %84 = arith.subf %80, %83 : vector<8x8xf32>
    %85 = math.exp %84 : vector<8x8xf32>
    %cst_20 = arith.constant dense<0.000000e+00> : vector<8xf32>
    %86 = vector.multi_reduction <add>, %85, %cst_20 [1] : vector<8x8xf32> to vector<8xf32>
    %87 = vector.shape_cast %86 : vector<8xf32> to vector<8x1xf32>
    %88 = tpu.reciprocal %87 {approx = true} : vector<8x1xf32> -> vector<8x1xf32>
    %89 = vector.broadcast %88 : vector<8x1xf32> to vector<8x8xf32>
    %90 = arith.mulf %85, %89 : vector<8x8xf32>
    %91 = vector.extract_strided_slice %56 {offsets = [0, 8], sizes = [8, 8], strides = [1, 1]} : vector<8x32xf32> to vector<8x8xf32>
    %cst_21 = arith.constant dense<0.000000e+00> : vector<8x8xf32>
    %92 = tpu.matmul %90, %91, %cst_21 {dimension_numbers = #tpu.dot_dimension_numbers<[1], [0], [0], [1], [0, 0, 1, 1], [], []>} : vector<8x8xf32>, vector<8x8xf32>, vector<8x8xf32> -> vector<8x8xf32>
    %93 = vector.extract_strided_slice %54 {offsets = [0, 16], sizes = [8, 8], strides = [1, 1]} : vector<8x32xf32> to vector<8x8xf32>
    %94 = vector.extract_strided_slice %55 {offsets = [0, 16], sizes = [8, 8], strides = [1, 1]} : vector<8x32xf32> to vector<8x8xf32>
    %95 = tpu.transpose %94, [1, 0] : vector<8x8xf32> -> vector<8x8xf32>
    %cst_22 = arith.constant dense<0.000000e+00> : vector<8x8xf32>
    %96 = tpu.matmul %93, %95, %cst_22 {dimension_numbers = #tpu.dot_dimension_numbers<[1], [0], [0], [1], [0, 0, 1, 1], [], []>} : vector<8x8xf32>, vector<8x8xf32>, vector<8x8xf32> -> vector<8x8xf32>
    %97 = vector.broadcast %53 : vector<1x8xf32> to vector<8x8xf32>
    %98 = arith.addf %96, %97 : vector<8x8xf32>
    %cst_23 = arith.constant dense<0xFF800000> : vector<8xf32>
    %99 = vector.multi_reduction <maximumf>, %98, %cst_23 [1] : vector<8x8xf32> to vector<8xf32>
    %100 = vector.shape_cast %99 : vector<8xf32> to vector<8x1xf32>
    %101 = vector.broadcast %100 : vector<8x1xf32> to vector<8x8xf32>
    %102 = arith.subf %98, %101 : vector<8x8xf32>
    %103 = math.exp %102 : vector<8x8xf32>
    %cst_24 = arith.constant dense<0.000000e+00> : vector<8xf32>
    %104 = vector.multi_reduction <add>, %103, %cst_24 [1] : vector<8x8xf32> to vector<8xf32>
    %105 = vector.shape_cast %104 : vector<8xf32> to vector<8x1xf32>
    %106 = tpu.reciprocal %105 {approx = true} : vector<8x1xf32> -> vector<8x1xf32>
    %107 = vector.broadcast %106 : vector<8x1xf32> to vector<8x8xf32>
    %108 = arith.mulf %103, %107 : vector<8x8xf32>
    %109 = vector.extract_strided_slice %56 {offsets = [0, 16], sizes = [8, 8], strides = [1, 1]} : vector<8x32xf32> to vector<8x8xf32>
    %cst_25 = arith.constant dense<0.000000e+00> : vector<8x8xf32>
    %110 = tpu.matmul %108, %109, %cst_25 {dimension_numbers = #tpu.dot_dimension_numbers<[1], [0], [0], [1], [0, 0, 1, 1], [], []>} : vector<8x8xf32>, vector<8x8xf32>, vector<8x8xf32> -> vector<8x8xf32>
    %111 = vector.extract_strided_slice %54 {offsets = [0, 24], sizes = [8, 8], strides = [1, 1]} : vector<8x32xf32> to vector<8x8xf32>
    %112 = vector.extract_strided_slice %55 {offsets = [0, 24], sizes = [8, 8], strides = [1, 1]} : vector<8x32xf32> to vector<8x8xf32>
    %113 = tpu.transpose %112, [1, 0] : vector<8x8xf32> -> vector<8x8xf32>
    %cst_26 = arith.constant dense<0.000000e+00> : vector<8x8xf32>
    %114 = tpu.matmul %111, %113, %cst_26 {dimension_numbers = #tpu.dot_dimension_numbers<[1], [0], [0], [1], [0, 0, 1, 1], [], []>} : vector<8x8xf32>, vector<8x8xf32>, vector<8x8xf32> -> vector<8x8xf32>
    %115 = vector.broadcast %53 : vector<1x8xf32> to vector<8x8xf32>
    %116 = arith.addf %114, %115 : vector<8x8xf32>
    %cst_27 = arith.constant dense<0xFF800000> : vector<8xf32>
    %117 = vector.multi_reduction <maximumf>, %116, %cst_27 [1] : vector<8x8xf32> to vector<8xf32>
    %118 = vector.shape_cast %117 : vector<8xf32> to vector<8x1xf32>
    %119 = vector.broadcast %118 : vector<8x1xf32> to vector<8x8xf32>
    %120 = arith.subf %116, %119 : vector<8x8xf32>
    %121 = math.exp %120 : vector<8x8xf32>
    %cst_28 = arith.constant dense<0.000000e+00> : vector<8xf32>
    %122 = vector.multi_reduction <add>, %121, %cst_28 [1] : vector<8x8xf32> to vector<8xf32>
    %123 = vector.shape_cast %122 : vector<8xf32> to vector<8x1xf32>
    %124 = tpu.reciprocal %123 {approx = true} : vector<8x1xf32> -> vector<8x1xf32>
    %125 = vector.broadcast %124 : vector<8x1xf32> to vector<8x8xf32>
    %126 = arith.mulf %121, %125 : vector<8x8xf32>
    %127 = vector.extract_strided_slice %56 {offsets = [0, 24], sizes = [8, 8], strides = [1, 1]} : vector<8x32xf32> to vector<8x8xf32>
    %cst_29 = arith.constant dense<0.000000e+00> : vector<8x8xf32>
    %128 = tpu.matmul %126, %127, %cst_29 {dimension_numbers = #tpu.dot_dimension_numbers<[1], [0], [0], [1], [0, 0, 1, 1], [], []>} : vector<8x8xf32>, vector<8x8xf32>, vector<8x8xf32> -> vector<8x8xf32>
    %129 = tpu.concatenate %74, %92, %110, %128 in 1 : vector<8x8xf32>, vector<8x8xf32>, vector<8x8xf32>, vector<8x8xf32> -> vector<8x32xf32>
    %c1 = arith.constant 1 : index
    %c0_30 = arith.constant 0 : index
    %c0_31 = arith.constant 0 : index
    %130 = vector.load %arg2[%c1, %c0_30, %c0_31] : memref<2x1x8xf32, #tpu.memory_space<vmem>>, vector<1x1x8xf32>
    %131 = vector.shape_cast %130 : vector<1x1x8xf32> to vector<1x8xf32>
    %cst_32 = arith.constant -1.000000e+30 : f32
    %132 = vector.broadcast %cst_32 : f32 to vector<1x8xf32>
    %133 = arith.mulf %131, %132 : vector<1x8xf32>
    %134 = vector.extract_strided_slice %47 {offsets = [8, 0], sizes = [8, 32], strides = [1, 1]} : vector<16x32xf32> to vector<8x32xf32>
    %135 = vector.extract_strided_slice %48 {offsets = [8, 0], sizes = [8, 32], strides = [1, 1]} : vector<16x32xf32> to vector<8x32xf32>
    %136 = vector.extract_strided_slice %49 {offsets = [8, 0], sizes = [8, 32], strides = [1, 1]} : vector<16x32xf32> to vector<8x32xf32>
    %137 = vector.extract_strided_slice %134 {offsets = [0, 0], sizes = [8, 8], strides = [1, 1]} : vector<8x32xf32> to vector<8x8xf32>
    %138 = vector.extract_strided_slice %135 {offsets = [0, 0], sizes = [8, 8], strides = [1, 1]} : vector<8x32xf32> to vector<8x8xf32>
    %139 = tpu.transpose %138, [1, 0] : vector<8x8xf32> -> vector<8x8xf32>
    %cst_33 = arith.constant dense<0.000000e+00> : vector<8x8xf32>
    %140 = tpu.matmul %137, %139, %cst_33 {dimension_numbers = #tpu.dot_dimension_numbers<[1], [0], [0], [1], [0, 0, 1, 1], [], []>} : vector<8x8xf32>, vector<8x8xf32>, vector<8x8xf32> -> vector<8x8xf32>
    %141 = vector.broadcast %133 : vector<1x8xf32> to vector<8x8xf32>
    %142 = arith.addf %140, %141 : vector<8x8xf32>
    %cst_34 = arith.constant dense<0xFF800000> : vector<8xf32>
    %143 = vector.multi_reduction <maximumf>, %142, %cst_34 [1] : vector<8x8xf32> to vector<8xf32>
    %144 = vector.shape_cast %143 : vector<8xf32> to vector<8x1xf32>
    %145 = vector.broadcast %144 : vector<8x1xf32> to vector<8x8xf32>
    %146 = arith.subf %142, %145 : vector<8x8xf32>
    %147 = math.exp %146 : vector<8x8xf32>
    %cst_35 = arith.constant dense<0.000000e+00> : vector<8xf32>
    %148 = vector.multi_reduction <add>, %147, %cst_35 [1] : vector<8x8xf32> to vector<8xf32>
    %149 = vector.shape_cast %148 : vector<8xf32> to vector<8x1xf32>
    %150 = tpu.reciprocal %149 {approx = true} : vector<8x1xf32> -> vector<8x1xf32>
    %151 = vector.broadcast %150 : vector<8x1xf32> to vector<8x8xf32>
    %152 = arith.mulf %147, %151 : vector<8x8xf32>
    %153 = vector.extract_strided_slice %136 {offsets = [0, 0], sizes = [8, 8], strides = [1, 1]} : vector<8x32xf32> to vector<8x8xf32>
    %cst_36 = arith.constant dense<0.000000e+00> : vector<8x8xf32>
    %154 = tpu.matmul %152, %153, %cst_36 {dimension_numbers = #tpu.dot_dimension_numbers<[1], [0], [0], [1], [0, 0, 1, 1], [], []>} : vector<8x8xf32>, vector<8x8xf32>, vector<8x8xf32> -> vector<8x8xf32>
    %155 = vector.extract_strided_slice %134 {offsets = [0, 8], sizes = [8, 8], strides = [1, 1]} : vector<8x32xf32> to vector<8x8xf32>
    %156 = vector.extract_strided_slice %135 {offsets = [0, 8], sizes = [8, 8], strides = [1, 1]} : vector<8x32xf32> to vector<8x8xf32>
    %157 = tpu.transpose %156, [1, 0] : vector<8x8xf32> -> vector<8x8xf32>
    %cst_37 = arith.constant dense<0.000000e+00> : vector<8x8xf32>
    %158 = tpu.matmul %155, %157, %cst_37 {dimension_numbers = #tpu.dot_dimension_numbers<[1], [0], [0], [1], [0, 0, 1, 1], [], []>} : vector<8x8xf32>, vector<8x8xf32>, vector<8x8xf32> -> vector<8x8xf32>
    %159 = vector.broadcast %133 : vector<1x8xf32> to vector<8x8xf32>
    %160 = arith.addf %158, %159 : vector<8x8xf32>
    %cst_38 = arith.constant dense<0xFF800000> : vector<8xf32>
    %161 = vector.multi_reduction <maximumf>, %160, %cst_38 [1] : vector<8x8xf32> to vector<8xf32>
    %162 = vector.shape_cast %161 : vector<8xf32> to vector<8x1xf32>
    %163 = vector.broadcast %162 : vector<8x1xf32> to vector<8x8xf32>
    %164 = arith.subf %160, %163 : vector<8x8xf32>
    %165 = math.exp %164 : vector<8x8xf32>
    %cst_39 = arith.constant dense<0.000000e+00> : vector<8xf32>
    %166 = vector.multi_reduction <add>, %165, %cst_39 [1] : vector<8x8xf32> to vector<8xf32>
    %167 = vector.shape_cast %166 : vector<8xf32> to vector<8x1xf32>
    %168 = tpu.reciprocal %167 {approx = true} : vector<8x1xf32> -> vector<8x1xf32>
    %169 = vector.broadcast %168 : vector<8x1xf32> to vector<8x8xf32>
    %170 = arith.mulf %165, %169 : vector<8x8xf32>
    %171 = vector.extract_strided_slice %136 {offsets = [0, 8], sizes = [8, 8], strides = [1, 1]} : vector<8x32xf32> to vector<8x8xf32>
    %cst_40 = arith.constant dense<0.000000e+00> : vector<8x8xf32>
    %172 = tpu.matmul %170, %171, %cst_40 {dimension_numbers = #tpu.dot_dimension_numbers<[1], [0], [0], [1], [0, 0, 1, 1], [], []>} : vector<8x8xf32>, vector<8x8xf32>, vector<8x8xf32> -> vector<8x8xf32>
    %173 = vector.extract_strided_slice %134 {offsets = [0, 16], sizes = [8, 8], strides = [1, 1]} : vector<8x32xf32> to vector<8x8xf32>
    %174 = vector.extract_strided_slice %135 {offsets = [0, 16], sizes = [8, 8], strides = [1, 1]} : vector<8x32xf32> to vector<8x8xf32>
    %175 = tpu.transpose %174, [1, 0] : vector<8x8xf32> -> vector<8x8xf32>
    %cst_41 = arith.constant dense<0.000000e+00> : vector<8x8xf32>
    %176 = tpu.matmul %173, %175, %cst_41 {dimension_numbers = #tpu.dot_dimension_numbers<[1], [0], [0], [1], [0, 0, 1, 1], [], []>} : vector<8x8xf32>, vector<8x8xf32>, vector<8x8xf32> -> vector<8x8xf32>
    %177 = vector.broadcast %133 : vector<1x8xf32> to vector<8x8xf32>
    %178 = arith.addf %176, %177 : vector<8x8xf32>
    %cst_42 = arith.constant dense<0xFF800000> : vector<8xf32>
    %179 = vector.multi_reduction <maximumf>, %178, %cst_42 [1] : vector<8x8xf32> to vector<8xf32>
    %180 = vector.shape_cast %179 : vector<8xf32> to vector<8x1xf32>
    %181 = vector.broadcast %180 : vector<8x1xf32> to vector<8x8xf32>
    %182 = arith.subf %178, %181 : vector<8x8xf32>
    %183 = math.exp %182 : vector<8x8xf32>
    %cst_43 = arith.constant dense<0.000000e+00> : vector<8xf32>
    %184 = vector.multi_reduction <add>, %183, %cst_43 [1] : vector<8x8xf32> to vector<8xf32>
    %185 = vector.shape_cast %184 : vector<8xf32> to vector<8x1xf32>
    %186 = tpu.reciprocal %185 {approx = true} : vector<8x1xf32> -> vector<8x1xf32>
    %187 = vector.broadcast %186 : vector<8x1xf32> to vector<8x8xf32>
    %188 = arith.mulf %183, %187 : vector<8x8xf32>
    %189 = vector.extract_strided_slice %136 {offsets = [0, 16], sizes = [8, 8], strides = [1, 1]} : vector<8x32xf32> to vector<8x8xf32>
    %cst_44 = arith.constant dense<0.000000e+00> : vector<8x8xf32>
    %190 = tpu.matmul %188, %189, %cst_44 {dimension_numbers = #tpu.dot_dimension_numbers<[1], [0], [0], [1], [0, 0, 1, 1], [], []>} : vector<8x8xf32>, vector<8x8xf32>, vector<8x8xf32> -> vector<8x8xf32>
    %191 = vector.extract_strided_slice %134 {offsets = [0, 24], sizes = [8, 8], strides = [1, 1]} : vector<8x32xf32> to vector<8x8xf32>
    %192 = vector.extract_strided_slice %135 {offsets = [0, 24], sizes = [8, 8], strides = [1, 1]} : vector<8x32xf32> to vector<8x8xf32>
    %193 = tpu.transpose %192, [1, 0] : vector<8x8xf32> -> vector<8x8xf32>
    %cst_45 = arith.constant dense<0.000000e+00> : vector<8x8xf32>
    %194 = tpu.matmul %191, %193, %cst_45 {dimension_numbers = #tpu.dot_dimension_numbers<[1], [0], [0], [1], [0, 0, 1, 1], [], []>} : vector<8x8xf32>, vector<8x8xf32>, vector<8x8xf32> -> vector<8x8xf32>
    %195 = vector.broadcast %133 : vector<1x8xf32> to vector<8x8xf32>
    %196 = arith.addf %194, %195 : vector<8x8xf32>
    %cst_46 = arith.constant dense<0xFF800000> : vector<8xf32>
    %197 = vector.multi_reduction <maximumf>, %196, %cst_46 [1] : vector<8x8xf32> to vector<8xf32>
    %198 = vector.shape_cast %197 : vector<8xf32> to vector<8x1xf32>
    %199 = vector.broadcast %198 : vector<8x1xf32> to vector<8x8xf32>
    %200 = arith.subf %196, %199 : vector<8x8xf32>
    %201 = math.exp %200 : vector<8x8xf32>
    %cst_47 = arith.constant dense<0.000000e+00> : vector<8xf32>
    %202 = vector.multi_reduction <add>, %201, %cst_47 [1] : vector<8x8xf32> to vector<8xf32>
    %203 = vector.shape_cast %202 : vector<8xf32> to vector<8x1xf32>
    %204 = tpu.reciprocal %203 {approx = true} : vector<8x1xf32> -> vector<8x1xf32>
    %205 = vector.broadcast %204 : vector<8x1xf32> to vector<8x8xf32>
    %206 = arith.mulf %201, %205 : vector<8x8xf32>
    %207 = vector.extract_strided_slice %136 {offsets = [0, 24], sizes = [8, 8], strides = [1, 1]} : vector<8x32xf32> to vector<8x8xf32>
    %cst_48 = arith.constant dense<0.000000e+00> : vector<8x8xf32>
    %208 = tpu.matmul %206, %207, %cst_48 {dimension_numbers = #tpu.dot_dimension_numbers<[1], [0], [0], [1], [0, 0, 1, 1], [], []>} : vector<8x8xf32>, vector<8x8xf32>, vector<8x8xf32> -> vector<8x8xf32>
    %209 = tpu.concatenate %154, %172, %190, %208 in 1 : vector<8x8xf32>, vector<8x8xf32>, vector<8x8xf32>, vector<8x8xf32> -> vector<8x32xf32>
    %210 = tpu.concatenate %129, %209 in 0 : vector<8x32xf32>, vector<8x32xf32> -> vector<16x32xf32>
    %c0_49 = arith.constant 0 : index
    %c0_50 = arith.constant 0 : index
    %211 = vector.load %arg4[%c0_49, %c0_50] : memref<32x32xf32, #tpu.memory_space<vmem>>, vector<32x32xf32>
    %cst_51 = arith.constant dense<0.000000e+00> : vector<16x32xf32>
    %212 = tpu.matmul %210, %211, %cst_51 {dimension_numbers = #tpu.dot_dimension_numbers<[1], [0], [0], [1], [0, 0, 1, 1], [], []>} : vector<16x32xf32>, vector<32x32xf32>, vector<16x32xf32> -> vector<16x32xf32>
    %213 = vector.shape_cast %11 : vector<32xf32> to vector<1x32xf32>
    %214 = vector.broadcast %213 : vector<1x32xf32> to vector<16x32xf32>
    %215 = arith.addf %212, %214 : vector<16x32xf32>
    %216 = arith.addf %41, %215 : vector<16x32xf32>
    %cst_52 = arith.constant dense<0.000000e+00> : vector<16xf32>
    %217 = vector.multi_reduction <add>, %216, %cst_52 [1] : vector<16x32xf32> to vector<16xf32>
    %218 = vector.shape_cast %217 : vector<16xf32> to vector<16x1xf32>
    %cst_53 = arith.constant 3.200000e+01 : f32
    %219 = vector.broadcast %cst_53 : f32 to vector<16x1xf32>
    %220 = arith.divf %218, %219 : vector<16x1xf32>
    %221 = vector.broadcast %220 : vector<16x1xf32> to vector<16x32xf32>
    %222 = arith.subf %216, %221 : vector<16x32xf32>
    %223 = arith.mulf %222, %222 : vector<16x32xf32>
    %cst_54 = arith.constant dense<0.000000e+00> : vector<16xf32>
    %224 = vector.multi_reduction <add>, %223, %cst_54 [1] : vector<16x32xf32> to vector<16xf32>
    %225 = vector.shape_cast %224 : vector<16xf32> to vector<16x1xf32>
    %cst_55 = arith.constant 3.200000e+01 : f32
    %226 = vector.broadcast %cst_55 : f32 to vector<16x1xf32>
    %227 = arith.divf %225, %226 : vector<16x1xf32>
    %228 = vector.broadcast %220 : vector<16x1xf32> to vector<16x32xf32>
    %229 = arith.subf %216, %228 : vector<16x32xf32>
    %cst_56 = arith.constant 9.99999974E-6 : f32
    %230 = vector.broadcast %cst_56 : f32 to vector<16x1xf32>
    %231 = arith.addf %227, %230 : vector<16x1xf32>
    %232 = math.rsqrt %231 : vector<16x1xf32>
    %233 = vector.broadcast %232 : vector<16x1xf32> to vector<16x32xf32>
    %234 = arith.mulf %229, %233 : vector<16x32xf32>
    %235 = vector.shape_cast %7 : vector<32xf32> to vector<1x32xf32>
    %236 = vector.broadcast %235 : vector<1x32xf32> to vector<16x32xf32>
    %237 = arith.mulf %234, %236 : vector<16x32xf32>
    %238 = vector.shape_cast %9 : vector<32xf32> to vector<1x32xf32>
    %239 = vector.broadcast %238 : vector<1x32xf32> to vector<16x32xf32>
    %240 = arith.addf %237, %239 : vector<16x32xf32>
    %c0_57 = arith.constant 0 : index
    %c0_58 = arith.constant 0 : index
    %241 = vector.load %arg5[%c0_57, %c0_58] : memref<32x64xf32, #tpu.memory_space<vmem>>, vector<32x64xf32>
    %cst_59 = arith.constant dense<0.000000e+00> : vector<16x64xf32>
    %242 = tpu.matmul %240, %241, %cst_59 {dimension_numbers = #tpu.dot_dimension_numbers<[1], [0], [0], [1], [0, 0, 1, 1], [], []>} : vector<16x32xf32>, vector<32x64xf32>, vector<16x64xf32> -> vector<16x64xf32>
    %243 = vector.shape_cast %17 : vector<64xf32> to vector<1x64xf32>
    %244 = vector.broadcast %243 : vector<1x64xf32> to vector<16x64xf32>
    %245 = arith.addf %242, %244 : vector<16x64xf32>
    %cst_60 = arith.constant 0.000000e+00 : f32
    %246 = vector.broadcast %cst_60 : f32 to vector<16x64xf32>
    %247 = arith.maximumf %245, %246 : vector<16x64xf32>
    %c0_61 = arith.constant 0 : index
    %c0_62 = arith.constant 0 : index
    %248 = vector.load %arg6[%c0_61, %c0_62] : memref<64x32xf32, #tpu.memory_space<vmem>>, vector<64x32xf32>
    %cst_63 = arith.constant dense<0.000000e+00> : vector<16x32xf32>
    %249 = tpu.matmul %247, %248, %cst_63 {dimension_numbers = #tpu.dot_dimension_numbers<[1], [0], [0], [1], [0, 0, 1, 1], [], []>} : vector<16x64xf32>, vector<64x32xf32>, vector<16x32xf32> -> vector<16x32xf32>
    %250 = vector.shape_cast %13 : vector<32xf32> to vector<1x32xf32>
    %251 = vector.broadcast %250 : vector<1x32xf32> to vector<16x32xf32>
    %252 = arith.addf %249, %251 : vector<16x32xf32>
    %253 = arith.addf %240, %252 : vector<16x32xf32>
    %c0_64 = arith.constant 0 : index
    %c0_65 = arith.constant 0 : index
    %254 = vector.load %arg8[%c0_64, %c0_65] : memref<16x32xf32, #tpu.memory_space<vmem>>, vector<16x32xf32>
    tpu.vector_store %arg8[%c0_64, %c0_65], %253 {strides = array<i32>} : memref<16x32xf32, #tpu.memory_space<vmem>>, vector<16x32xf32>,
    return
  }
  func.func @transform_0(%arg0: i32) -> (i32, i32) {
    %c0_i32 = arith.constant 0 : i32
    %c0_i32_0 = arith.constant 0 : i32
    return %arg0, %c0_i32 : i32, i32
  }
  func.func @transform_1(%arg0: i32) -> (i32, i32, i32) {
    %c0_i32 = arith.constant 0 : i32
    %c0_i32_0 = arith.constant 0 : i32
    %c0_i32_1 = arith.constant 0 : i32
    return %arg0, %c0_i32, %c0_i32_0 : i32, i32, i32
  }
  func.func @transform_2(%arg0: i32) -> (i32, i32) {
    %c0_i32 = arith.constant 0 : i32
    %c0_i32_0 = arith.constant 0 : i32
    %c0_i32_1 = arith.constant 0 : i32
    return %c0_i32, %c0_i32_0 : i32, i32
  }
  func.func @transform_3(%arg0: i32) -> (i32, i32) {
    %c0_i32 = arith.constant 0 : i32
    %c0_i32_0 = arith.constant 0 : i32
    %c0_i32_1 = arith.constant 0 : i32
    return %c0_i32, %c0_i32_0 : i32, i32
  }
  func.func @transform_4(%arg0: i32) -> (i32, i32) {
    %c0_i32 = arith.constant 0 : i32
    %c0_i32_0 = arith.constant 0 : i32
    %c0_i32_1 = arith.constant 0 : i32
    return %c0_i32, %c0_i32_0 : i32, i32
  }
  func.func @transform_5(%arg0: i32) -> (i32, i32) {
    %c0_i32 = arith.constant 0 : i32
    %c0_i32_0 = arith.constant 0 : i32
    %c0_i32_1 = arith.constant 0 : i32
    return %c0_i32, %c0_i32_0 : i32, i32
  }
  func.func @transform_6(%arg0: i32) -> (i32, i32) {
    %c0_i32 = arith.constant 0 : i32
    %c0_i32_0 = arith.constant 0 : i32
    %c0_i32_1 = arith.constant 0 : i32
    return %c0_i32, %c0_i32_0 : i32, i32
  }
  func.func @transform_7(%arg0: i32) -> (i32, i32) {
    %c0_i32 = arith.constant 0 : i32
    %c0_i32_0 = arith.constant 0 : i32
    return %arg0, %c0_i32 : i32, i32
  }
}

module attributes {stable_mosaic.version = 11 : i64} {
  func.func @transformer_block_kernel(%arg0: i32, %arg1: memref<16x32xf32, #tpu.memory_space<vmem>>, %arg2: memref<2x1x8xf32, #tpu.memory_space<vmem>>, %arg3: memref<32x96xf32, #tpu.memory_space<vmem>>, %arg4: memref<32x32xf32, #tpu.memory_space<vmem>>, %arg5: memref<32x64xf32, #tpu.memory_space<vmem>>, %arg6: memref<64x32xf32, #tpu.memory_space<vmem>>, %arg7: memref<8x128xf32, #tpu.memory_space<vmem>>, %arg8: memref<16x32xf32, #tpu.memory_space<vmem>>) attributes {dimension_semantics = [#tpu.dimension_semantics<parallel>], iteration_bounds = array<i64: 1>, scalar_prefetch = 0 : i64, scratch_operands = 0 : i64, tpu.core_type = #tpu.core_type<tc>, window_params = [{transform_indices = @transform_0, window_bounds = array<i64: 16, 32>}, {transform_indices = @transform_1, window_bounds = array<i64: 2, 1, 8>}, {pipeline_mode = #tpu.pipeline_mode<synchronous>, transform_indices = @transform_2, window_bounds = array<i64: 32, 96>}, {pipeline_mode = #tpu.pipeline_mode<synchronous>, transform_indices = @transform_3, window_bounds = array<i64: 32, 32>}, {pipeline_mode = #tpu.pipeline_mode<synchronous>, transform_indices = @transform_4, window_bounds = array<i64: 32, 64>}, {pipeline_mode = #tpu.pipeline_mode<synchronous>, transform_indices = @transform_5, window_bounds = array<i64: 64, 32>}, {pipeline_mode = #tpu.pipeline_mode<synchronous>, transform_indices = @transform_6, window_bounds = array<i64: 8, 128>}, {transform_indices = @transform_7, window_bounds = array<i64: 16, 32>}]} {
    %c0 = arith.constant 0 : index
    %c0_0 = arith.constant 0 : index
    %0 = vector.load %arg1[%c0, %c0_0] : memref<16x32xf32, #tpu.memory_space<vmem>>, vector<16x32xf32>
    %c0_1 = arith.constant 0 : index
    %c0_2 = arith.constant 0 : index
    %1 = vector.load %arg7[%c0_1, %c0_2] : memref<8x128xf32, #tpu.memory_space<vmem>>, vector<8x128xf32>
    %2 = vector.extract_strided_slice %1 {offsets = [0, 0], sizes = [1, 32], strides = [1, 1]} : vector<8x128xf32> to vector<1x32xf32>
    %3 = vector.shape_cast %2 : vector<1x32xf32> to vector<32xf32>
    %4 = vector.extract_strided_slice %1 {offsets = [1, 0], sizes = [1, 32], strides = [1, 1]} : vector<8x128xf32> to vector<1x32xf32>
    %5 = vector.shape_cast %4 : vector<1x32xf32> to vector<32xf32>
    %6 = vector.extract_strided_slice %1 {offsets = [2, 0], sizes = [1, 32], strides = [1, 1]} : vector<8x128xf32> to vector<1x32xf32>
    %7 = vector.shape_cast %6 : vector<1x32xf32> to vector<32xf32>
    %8 = vector.extract_strided_slice %1 {offsets = [3, 0], sizes = [1, 32], strides = [1, 1]} : vector<8x128xf32> to vector<1x32xf32>
    %9 = vector.shape_cast %8 : vector<1x32xf32> to vector<32xf32>
    %10 = vector.extract_strided_slice %1 {offsets = [4, 0], sizes = [1, 32], strides = [1, 1]} : vector<8x128xf32> to vector<1x32xf32>
    %11 = vector.shape_cast %10 : vector<1x32xf32> to vector<32xf32>
    %12 = vector.extract_strided_slice %1 {offsets = [5, 0], sizes = [1, 32], strides = [1, 1]} : vector<8x128xf32> to vector<1x32xf32>
    %13 = vector.shape_cast %12 : vector<1x32xf32> to vector<32xf32>
    %14 = vector.extract_strided_slice %1 {offsets = [6, 0], sizes = [1, 96], strides = [1, 1]} : vector<8x128xf32> to vector<1x96xf32>
    %15 = vector.shape_cast %14 : vector<1x96xf32> to vector<96xf32>
    %16 = vector.extract_strided_slice %1 {offsets = [7, 0], sizes = [1, 64], strides = [1, 1]} : vector<8x128xf32> to vector<1x64xf32>
    %17 = vector.shape_cast %16 : vector<1x64xf32> to vector<64xf32>
    %cst = arith.constant dense<0.000000e+00> : vector<16xf32>
    %18 = vector.multi_reduction <add>, %0, %cst [1] : vector<16x32xf32> to vector<16xf32>
    %19 = vector.shape_cast %18 : vector<16xf32> to vector<16x1xf32>
    %cst_3 = arith.constant 3.200000e+01 : f32
    %20 = vector.broadcast %cst_3 : f32 to vector<16x1xf32>
    %21 = arith.divf %19, %20 : vector<16x1xf32>
    %22 = vector.broadcast %21 : vector<16x1xf32> to vector<16x32xf32>
    %23 = arith.subf %0, %22 : vector<16x32xf32>
    %24 = arith.mulf %23, %23 : vector<16x32xf32>
    %cst_4 = arith.constant dense<0.000000e+00> : vector<16xf32>
    %25 = vector.multi_reduction <add>, %24, %cst_4 [1] : vector<16x32xf32> to vector<16xf32>
    %26 = vector.shape_cast %25 : vector<16xf32> to vector<16x1xf32>
    %cst_5 = arith.constant 3.200000e+01 : f32
    %27 = vector.broadcast %cst_5 : f32 to vector<16x1xf32>
    %28 = arith.divf %26, %27 : vector<16x1xf32>
    %29 = vector.broadcast %21 : vector<16x1xf32> to vector<16x32xf32>
    %30 = arith.subf %0, %29 : vector<16x32xf32>
    %cst_6 = arith.constant 9.99999974E-6 : f32
    %31 = vector.broadcast %cst_6 : f32 to vector<16x1xf32>
    %32 = arith.addf %28, %31 : vector<16x1xf32>
    %33 = math.rsqrt %32 : vector<16x1xf32>
    %34 = vector.broadcast %33 : vector<16x1xf32> to vector<16x32xf32>
    %35 = arith.mulf %30, %34 : vector<16x32xf32>
    %36 = vector.shape_cast %3 : vector<32xf32> to vector<1x32xf32>
    %37 = vector.broadcast %36 : vector<1x32xf32> to vector<16x32xf32>
    %38 = arith.mulf %35, %37 : vector<16x32xf32>
    %39 = vector.shape_cast %5 : vector<32xf32> to vector<1x32xf32>
    %40 = vector.broadcast %39 : vector<1x32xf32> to vector<16x32xf32>
    %41 = arith.addf %38, %40 : vector<16x32xf32>
    %c0_7 = arith.constant 0 : index
    %c0_8 = arith.constant 0 : index
    %42 = vector.load %arg3[%c0_7, %c0_8] : memref<32x96xf32, #tpu.memory_space<vmem>>, vector<32x96xf32>
    %cst_9 = arith.constant dense<0.000000e+00> : vector<16x96xf32>
    %43 = tpu.matmul %41, %42, %cst_9 {dimension_numbers = #tpu.dot_dimension_numbers<[1], [0], [0], [1], [0, 0, 1, 1], [], []>} : vector<16x32xf32>, vector<32x96xf32>, vector<16x96xf32> -> vector<16x96xf32>
    %44 = vector.shape_cast %15 : vector<96xf32> to vector<1x96xf32>
    %45 = vector.broadcast %44 : vector<1x96xf32> to vector<16x96xf32>
    %46 = arith.addf %43, %45 : vector<16x96xf32>
    %47 = vector.extract_strided_slice %46 {offsets = [0, 0], sizes = [16, 32], strides = [1, 1]} : vector<16x96xf32> to vector<16x32xf32>
    %48 = vector.extract_strided_slice %46 {offsets = [0, 32], sizes = [16, 32], strides = [1, 1]} : vector<16x96xf32> to vector<16x32xf32>
    %49 = vector.extract_strided_slice %46 {offsets = [0, 64], sizes = [16, 32], strides = [1, 1]} : vector<16x96xf32> to vector<16x32xf32>
    %c0_10 = arith.constant 0 : index
    %c0_11 = arith.constant 0 : index
    %c0_12 = arith.constant 0 : index
    %50 = vector.load %arg2[%c0_10, %c0_11, %c0_12] : memref<2x1x8xf32, #tpu.memory_space<vmem>>, vector<1x1x8xf32>
    %51 = vector.shape_cast %50 : vector<1x1x8xf32> to vector<1x8xf32>
    %cst_13 = arith.constant -1.000000e+30 : f32
    %52 = vector.broadcast %cst_13 : f32 to vector<1x8xf32>
    %53 = arith.mulf %51, %52 : vector<1x8xf32>
    %54 = vector.extract_strided_slice %47 {offsets = [0, 0], sizes = [8, 32], strides = [1, 1]} : vector<16x32xf32> to vector<8x32xf32>
    %55 = vector.extract_strided_slice %48 {offsets = [0, 0], sizes = [8, 32], strides = [1, 1]} : vector<16x32xf32> to vector<8x32xf32>
    %56 = vector.extract_strided_slice %49 {offsets = [0, 0], sizes = [8, 32], strides = [1, 1]} : vector<16x32xf32> to vector<8x32xf32>
    %57 = vector.extract_strided_slice %54 {offsets = [0, 0], sizes = [8, 8], strides = [1, 1]} : vector<8x32xf32> to vector<8x8xf32>
    %58 = vector.extract_strided_slice %55 {offsets = [0, 0], sizes = [8, 8], strides = [1, 1]} : vector<8x32xf32> to vector<8x8xf32>
    %59 = tpu.transpose %58, [1, 0] : vector<8x8xf32> -> vector<8x8xf32>
    %cst_14 = arith.constant dense<0.000000e+00> : vector<8x8xf32>
    %60 = tpu.matmul %57, %59, %cst_14 {dimension_numbers = #tpu.dot_dimension_numbers<[1], [0], [0], [1], [0, 0, 1, 1], [], []>} : vector<8x8xf32>, vector<8x8xf32>, vector<8x8xf32> -> vector<8x8xf32>
    %61 = vector.broadcast %53 : vector<1x8xf32> to vector<8x8xf32>
    %62 = arith.addf %60, %61 : vector<8x8xf32>
    %cst_15 = arith.constant dense<0xFF800000> : vector<8xf32>
    %63 = vector.multi_reduction <maximumf>, %62, %cst_15 [1] : vector<8x8xf32> to vector<8xf32>
    %64 = vector.shape_cast %63 : vector<8xf32> to vector<8x1xf32>
    %65 = vector.broadcast %64 : vector<8x1xf32> to vector<8x8xf32>
    %66 = arith.subf %62, %65 : vector<8x8xf32>
    %67 = math.exp %66 : vector<8x8xf32>
    %cst_16 = arith.constant dense<0.000000e+00> : vector<8xf32>
    %68 = vector.multi_reduction <add>, %67, %cst_16 [1] : vector<8x8xf32> to vector<8xf32>
    %69 = vector.shape_cast %68 : vector<8xf32> to vector<8x1xf32>
    %70 = tpu.reciprocal %69 {approx = true} : vector<8x1xf32> -> vector<8x1xf32>
    %71 = vector.broadcast %70 : vector<8x1xf32> to vector<8x8xf32>
    %72 = arith.mulf %67, %71 : vector<8x8xf32>
    %73 = vector.extract_strided_slice %56 {offsets = [0, 0], sizes = [8, 8], strides = [1, 1]} : vector<8x32xf32> to vector<8x8xf32>
    %cst_17 = arith.constant dense<0.000000e+00> : vector<8x8xf32>
    %74 = tpu.matmul %72, %73, %cst_17 {dimension_numbers = #tpu.dot_dimension_numbers<[1], [0], [0], [1], [0, 0, 1, 1], [], []>} : vector<8x8xf32>, vector<8x8xf32>, vector<8x8xf32> -> vector<8x8xf32>
    %75 = vector.extract_strided_slice %54 {offsets = [0, 8], sizes = [8, 8], strides = [1, 1]} : vector<8x32xf32> to vector<8x8xf32>
    %76 = vector.extract_strided_slice %55 {offsets = [0, 8], sizes = [8, 8], strides = [1, 1]} : vector<8x32xf32> to vector<8x8xf32>
    %77 = tpu.transpose %76, [1, 0] : vector<8x8xf32> -> vector<8x8xf32>
    %cst_18 = arith.constant dense<0.000000e+00> : vector<8x8xf32>
    %78 = tpu.matmul %75, %77, %cst_18 {dimension_numbers = #tpu.dot_dimension_numbers<[1], [0], [0], [1], [0, 0, 1, 1], [], []>} : vector<8x8xf32>, vector<8x8xf32>, vector<8x8xf32> -> vector<8x8xf32>
    %79 = vector.broadcast %53 : vector<1x8xf32> to vector<8x8xf32>
    %80 = arith.addf %78, %79 : vector<8x8xf32>
    %cst_19 = arith.constant dense<0xFF800000> : vector<8xf32>
    %81 = vector.multi_reduction <maximumf>, %80, %cst_19 [1] : vector<8x8xf32> to vector<8xf32>
    %82 = vector.shape_cast %81 : vector<8xf32> to vector<8x1xf32>
    %83 = vector.broadcast %82 : vector<8x1xf32> to vector<8x8xf32>
    %84 = arith.subf %80, %83 : vector<8x8xf32>
    %85 = math.exp %84 : vector<8x8xf32>
    %cst_20 = arith.constant dense<0.000000e+00> : vector<8xf32>
    %86 = vector.multi_reduction <add>, %85, %cst_20 [1] : vector<8x8xf32> to vector<8xf32>
    %87 = vector.shape_cast %86 : vector<8xf32> to vector<8x1xf32>
    %88 = tpu.reciprocal %87 {approx = true} : vector<8x1xf32> -> vector<8x1xf32>
    %89 = vector.broadcast %88 : vector<8x1xf32> to vector<8x8xf32>
    %90 = arith.mulf %85, %89 : vector<8x8xf32>
    %91 = vector.extract_strided_slice %56 {offsets = [0, 8], sizes = [8, 8], strides = [1, 1]} : vector<8x32xf32> to vector<8x8xf32>
    %cst_21 = arith.constant dense<0.000000e+00> : vector<8x8xf32>
    %92 = tpu.matmul %90, %91, %cst_21 {dimension_numbers = #tpu.dot_dimension_numbers<[1], [0], [0], [1], [0, 0, 1, 1], [], []>} : vector<8x8xf32>, vector<8x8xf32>, vector<8x8xf32> -> vector<8x8xf32>
    %93 = vector.extract_strided_slice %54 {offsets = [0, 16], sizes = [8, 8], strides = [1, 1]} : vector<8x32xf32> to vector<8x8xf32>
    %94 = vector.extract_strided_slice %55 {offsets = [0, 16], sizes = [8, 8], strides = [1, 1]} : vector<8x32xf32> to vector<8x8xf32>
    %95 = tpu.transpose %94, [1, 0] : vector<8x8xf32> -> vector<8x8xf32>
    %cst_22 = arith.constant dense<0.000000e+00> : vector<8x8xf32>
    %96 = tpu.matmul %93, %95, %cst_22 {dimension_numbers = #tpu.dot_dimension_numbers<[1], [0], [0], [1], [0, 0, 1, 1], [], []>} : vector<8x8xf32>, vector<8x8xf32>, vector<8x8xf32> -> vector<8x8xf32>
    %97 = vector.broadcast %53 : vector<1x8xf32> to vector<8x8xf32>
    %98 = arith.addf %96, %97 : vector<8x8xf32>
    %cst_23 = arith.constant dense<0xFF800000> : vector<8xf32>
    %99 = vector.multi_reduction <maximumf>, %98, %cst_23 [1] : vector<8x8xf32> to vector<8xf32>
    %100 = vector.shape_cast %99 : vector<8xf32> to vector<8x1xf32>
    %101 = vector.broadcast %100 : vector<8x1xf32> to vector<8x8xf32>
    %102 = arith.subf %98, %101 : vector<8x8xf32>
    %103 = math.exp %102 : vector<8x8xf32>
    %cst_24 = arith.constant dense<0.000000e+00> : vector<8xf32>
    %104 = vector.multi_reduction <add>, %103, %cst_24 [1] : vector<8x8xf32> to vector<8xf32>
    %105 = vector.shape_cast %104 : vector<8xf32> to vector<8x1xf32>
    %106 = tpu.reciprocal %105 {approx = true} : vector<8x1xf32> -> vector<8x1xf32>
    %107 = vector.broadcast %106 : vector<8x1xf32> to vector<8x8xf32>
    %108 = arith.mulf %103, %107 : vector<8x8xf32>
    %109 = vector.extract_strided_slice %56 {offsets = [0, 16], sizes = [8, 8], strides = [1, 1]} : vector<8x32xf32> to vector<8x8xf32>
    %cst_25 = arith.constant dense<0.000000e+00> : vector<8x8xf32>
    %110 = tpu.matmul %108, %109, %cst_25 {dimension_numbers = #tpu.dot_dimension_numbers<[1], [0], [0], [1], [0, 0, 1, 1], [], []>} : vector<8x8xf32>, vector<8x8xf32>, vector<8x8xf32> -> vector<8x8xf32>
    %111 = vector.extract_strided_slice %54 {offsets = [0, 24], sizes = [8, 8], strides = [1, 1]} : vector<8x32xf32> to vector<8x8xf32>
    %112 = vector.extract_strided_slice %55 {offsets = [0, 24], sizes = [8, 8], strides = [1, 1]} : vector<8x32xf32> to vector<8x8xf32>
    %113 = tpu.transpose %112, [1, 0] : vector<8x8xf32> -> vector<8x8xf32>
    %cst_26 = arith.constant dense<0.000000e+00> : vector<8x8xf32>
    %114 = tpu.matmul %111, %113, %cst_26 {dimension_numbers = #tpu.dot_dimension_numbers<[1], [0], [0], [1], [0, 0, 1, 1], [], []>} : vector<8x8xf32>, vector<8x8xf32>, vector<8x8xf32> -> vector<8x8xf32>
    %115 = vector.broadcast %53 : vector<1x8xf32> to vector<8x8xf32>
    %116 = arith.addf %114, %115 : vector<8x8xf32>
    %cst_27 = arith.constant dense<0xFF800000> : vector<8xf32>
    %117 = vector.multi_reduction <maximumf>, %116, %cst_27 [1] : vector<8x8xf32> to vector<8xf32>
    %118 = vector.shape_cast %117 : vector<8xf32> to vector<8x1xf32>
    %119 = vector.broadcast %118 : vector<8x1xf32> to vector<8x8xf32>
    %120 = arith.subf %116, %119 : vector<8x8xf32>
    %121 = math.exp %120 : vector<8x8xf32>
    %cst_28 = arith.constant dense<0.000000e+00> : vector<8xf32>
    %122 = vector.multi_reduction <add>, %121, %cst_28 [1] : vector<8x8xf32> to vector<8xf32>
    %123 = vector.shape_cast %122 : vector<8xf32> to vector<8x1xf32>
    %124 = tpu.reciprocal %123 {approx = true} : vector<8x1xf32> -> vector<8x1xf32>
    %125 = vector.broadcast %124 : vector<8x1xf32> to vector<8x8xf32>
    %126 = arith.mulf %121, %125 : vector<8x8xf32>
    %127 = vector.extract_strided_slice %56 {offsets = [0, 24], sizes = [8, 8], strides = [1, 1]} : vector<8x32xf32> to vector<8x8xf32>
    %cst_29 = arith.constant dense<0.000000e+00> : vector<8x8xf32>
    %128 = tpu.matmul %126, %127, %cst_29 {dimension_numbers = #tpu.dot_dimension_numbers<[1], [0], [0], [1], [0, 0, 1, 1], [], []>} : vector<8x8xf32>, vector<8x8xf32>, vector<8x8xf32> -> vector<8x8xf32>
    %129 = tpu.concatenate %74, %92, %110, %128 in 1 : vector<8x8xf32>, vector<8x8xf32>, vector<8x8xf32>, vector<8x8xf32> -> vector<8x32xf32>
    %c1 = arith.constant 1 : index
    %c0_30 = arith.constant 0 : index
    %c0_31 = arith.constant 0 : index
    %130 = vector.load %arg2[%c1, %c0_30, %c0_31] : memref<2x1x8xf32, #tpu.memory_space<vmem>>, vector<1x1x8xf32>
    %131 = vector.shape_cast %130 : vector<1x1x8xf32> to vector<1x8xf32>
    %cst_32 = arith.constant -1.000000e+30 : f32
    %132 = vector.broadcast %cst_32 : f32 to vector<1x8xf32>
    %133 = arith.mulf %131, %132 : vector<1x8xf32>
    %134 = vector.extract_strided_slice %47 {offsets = [8, 0], sizes = [8, 32], strides = [1, 1]} : vector<16x32xf32> to vector<8x32xf32>
    %135 = vector.extract_strided_slice %48 {offsets = [8, 0], sizes = [8, 32], strides = [1, 1]} : vector<16x32xf32> to vector<8x32xf32>
    %136 = vector.extract_strided_slice %49 {offsets = [8, 0], sizes = [8, 32], strides = [1, 1]} : vector<16x32xf32> to vector<8x32xf32>
    %137 = vector.extract_strided_slice %134 {offsets = [0, 0], sizes = [8, 8], strides = [1, 1]} : vector<8x32xf32> to vector<8x8xf32>
    %138 = vector.extract_strided_slice %135 {offsets = [0, 0], sizes = [8, 8], strides = [1, 1]} : vector<8x32xf32> to vector<8x8xf32>
    %139 = tpu.transpose %138, [1, 0] : vector<8x8xf32> -> vector<8x8xf32>
    %cst_33 = arith.constant dense<0.000000e+00> : vector<8x8xf32>
    %140 = tpu.matmul %137, %139, %cst_33 {dimension_numbers = #tpu.dot_dimension_numbers<[1], [0], [0], [1], [0, 0, 1, 1], [], []>} : vector<8x8xf32>, vector<8x8xf32>, vector<8x8xf32> -> vector<8x8xf32>
    %141 = vector.broadcast %133 : vector<1x8xf32> to vector<8x8xf32>
    %142 = arith.addf %140, %141 : vector<8x8xf32>
    %cst_34 = arith.constant dense<0xFF800000> : vector<8xf32>
    %143 = vector.multi_reduction <maximumf>, %142, %cst_34 [1] : vector<8x8xf32> to vector<8xf32>
    %144 = vector.shape_cast %143 : vector<8xf32> to vector<8x1xf32>
    %145 = vector.broadcast %144 : vector<8x1xf32> to vector<8x8xf32>
    %146 = arith.subf %142, %145 : vector<8x8xf32>
    %147 = math.exp %146 : vector<8x8xf32>
    %cst_35 = arith.constant dense<0.000000e+00> : vector<8xf32>
    %148 = vector.multi_reduction <add>, %147, %cst_35 [1] : vector<8x8xf32> to vector<8xf32>
    %149 = vector.shape_cast %148 : vector<8xf32> to vector<8x1xf32>
    %150 = tpu.reciprocal %149 {approx = true} : vector<8x1xf32> -> vector<8x1xf32>
    %151 = vector.broadcast %150 : vector<8x1xf32> to vector<8x8xf32>
    %152 = arith.mulf %147, %151 : vector<8x8xf32>
    %153 = vector.extract_strided_slice %136 {offsets = [0, 0], sizes = [8, 8], strides = [1, 1]} : vector<8x32xf32> to vector<8x8xf32>
    %cst_36 = arith.constant dense<0.000000e+00> : vector<8x8xf32>
    %154 = tpu.matmul %152, %153, %cst_36 {dimension_numbers = #tpu.dot_dimension_numbers<[1], [0], [0], [1], [0, 0, 1, 1], [], []>} : vector<8x8xf32>, vector<8x8xf32>, vector<8x8xf32> -> vector<8x8xf32>
    %155 = vector.extract_strided_slice %134 {offsets = [0, 8], sizes = [8, 8], strides = [1, 1]} : vector<8x32xf32> to vector<8x8xf32>
    %156 = vector.extract_strided_slice %135 {offsets = [0, 8], sizes = [8, 8], strides = [1, 1]} : vector<8x32xf32> to vector<8x8xf32>
    %157 = tpu.transpose %156, [1, 0] : vector<8x8xf32> -> vector<8x8xf32>
    %cst_37 = arith.constant dense<0.000000e+00> : vector<8x8xf32>
    %158 = tpu.matmul %155, %157, %cst_37 {dimension_numbers = #tpu.dot_dimension_numbers<[1], [0], [0], [1], [0, 0, 1, 1], [], []>} : vector<8x8xf32>, vector<8x8xf32>, vector<8x8xf32> -> vector<8x8xf32>
    %159 = vector.broadcast %133 : vector<1x8xf32> to vector<8x8xf32>
    %160 = arith.addf %158, %159 : vector<8x8xf32>
    %cst_38 = arith.constant dense<0xFF800000> : vector<8xf32>
    %161 = vector.multi_reduction <maximumf>, %160, %cst_38 [1] : vector<8x8xf32> to vector<8xf32>
    %162 = vector.shape_cast %161 : vector<8xf32> to vector<8x1xf32>
    %163 = vector.broadcast %162 : vector<8x1xf32> to vector<8x8xf32>
    %164 = arith.subf %160, %163 : vector<8x8xf32>
    %165 = math.exp %164 : vector<8x8xf32>
    %cst_39 = arith.constant dense<0.000000e+00> : vector<8xf32>
    %166 = vector.multi_reduction <add>, %165, %cst_39 [1] : vector<8x8xf32> to vector<8xf32>
    %167 = vector.shape_cast %166 : vector<8xf32> to vector<8x1xf32>
    %168 = tpu.reciprocal %167 {approx = true} : vector<8x1xf32> -> vector<8x1xf32>
    %169 = vector.broadcast %168 : vector<8x1xf32> to vector<8x8xf32>
    %170 = arith.mulf %165, %169 : vector<8x8xf32>
    %171 = vector.extract_strided_slice %136 {offsets = [0, 8], sizes = [8, 8], strides = [1, 1]} : vector<8x32xf32> to vector<8x8xf32>
    %cst_40 = arith.constant dense<0.000000e+00> : vector<8x8xf32>
    %172 = tpu.matmul %170, %171, %cst_40 {dimension_numbers = #tpu.dot_dimension_numbers<[1], [0], [0], [1], [0, 0, 1, 1], [], []>} : vector<8x8xf32>, vector<8x8xf32>, vector<8x8xf32> -> vector<8x8xf32>
    %173 = vector.extract_strided_slice %134 {offsets = [0, 16], sizes = [8, 8], strides = [1, 1]} : vector<8x32xf32> to vector<8x8xf32>
    %174 = vector.extract_strided_slice %135 {offsets = [0, 16], sizes = [8, 8], strides = [1, 1]} : vector<8x32xf32> to vector<8x8xf32>
    %175 = tpu.transpose %174, [1, 0] : vector<8x8xf32> -> vector<8x8xf32>
    %cst_41 = arith.constant dense<0.000000e+00> : vector<8x8xf32>
    %176 = tpu.matmul %173, %175, %cst_41 {dimension_numbers = #tpu.dot_dimension_numbers<[1], [0], [0], [1], [0, 0, 1, 1], [], []>} : vector<8x8xf32>, vector<8x8xf32>, vector<8x8xf32> -> vector<8x8xf32>
    %177 = vector.broadcast %133 : vector<1x8xf32> to vector<8x8xf32>
    %178 = arith.addf %176, %177 : vector<8x8xf32>
    %cst_42 = arith.constant dense<0xFF800000> : vector<8xf32>
    %179 = vector.multi_reduction <maximumf>, %178, %cst_42 [1] : vector<8x8xf32> to vector<8xf32>
    %180 = vector.shape_cast %179 : vector<8xf32> to vector<8x1xf32>
    %181 = vector.broadcast %180 : vector<8x1xf32> to vector<8x8xf32>
    %182 = arith.subf %178, %181 : vector<8x8xf32>
    %183 = math.exp %182 : vector<8x8xf32>
    %cst_43 = arith.constant dense<0.000000e+00> : vector<8xf32>
    %184 = vector.multi_reduction <add>, %183, %cst_43 [1] : vector<8x8xf32> to vector<8xf32>
    %185 = vector.shape_cast %184 : vector<8xf32> to vector<8x1xf32>
    %186 = tpu.reciprocal %185 {approx = true} : vector<8x1xf32> -> vector<8x1xf32>
    %187 = vector.broadcast %186 : vector<8x1xf32> to vector<8x8xf32>
    %188 = arith.mulf %183, %187 : vector<8x8xf32>
    %189 = vector.extract_strided_slice %136 {offsets = [0, 16], sizes = [8, 8], strides = [1, 1]} : vector<8x32xf32> to vector<8x8xf32>
    %cst_44 = arith.constant dense<0.000000e+00> : vector<8x8xf32>
    %190 = tpu.matmul %188, %189, %cst_44 {dimension_numbers = #tpu.dot_dimension_numbers<[1], [0], [0], [1], [0, 0, 1, 1], [], []>} : vector<8x8xf32>, vector<8x8xf32>, vector<8x8xf32> -> vector<8x8xf32>
    %191 = vector.extract_strided_slice %134 {offsets = [0, 24], sizes = [8, 8], strides = [1, 1]} : vector<8x32xf32> to vector<8x8xf32>
    %192 = vector.extract_strided_slice %135 {offsets = [0, 24], sizes = [8, 8], strides = [1, 1]} : vector<8x32xf32> to vector<8x8xf32>
    %193 = tpu.transpose %192, [1, 0] : vector<8x8xf32> -> vector<8x8xf32>
    %cst_45 = arith.constant dense<0.000000e+00> : vector<8x8xf32>
    %194 = tpu.matmul %191, %193, %cst_45 {dimension_numbers = #tpu.dot_dimension_numbers<[1], [0], [0], [1], [0, 0, 1, 1], [], []>} : vector<8x8xf32>, vector<8x8xf32>, vector<8x8xf32> -> vector<8x8xf32>
    %195 = vector.broadcast %133 : vector<1x8xf32> to vector<8x8xf32>
    %196 = arith.addf %194, %195 : vector<8x8xf32>
    %cst_46 = arith.constant dense<0xFF800000> : vector<8xf32>
    %197 = vector.multi_reduction <maximumf>, %196, %cst_46 [1] : vector<8x8xf32> to vector<8xf32>
    %198 = vector.shape_cast %197 : vector<8xf32> to vector<8x1xf32>
    %199 = vector.broadcast %198 : vector<8x1xf32> to vector<8x8xf32>
    %200 = arith.subf %196, %199 : vector<8x8xf32>
    %201 = math.exp %200 : vector<8x8xf32>
    %cst_47 = arith.constant dense<0.000000e+00> : vector<8xf32>
    %202 = vector.multi_reduction <add>, %201, %cst_47 [1] : vector<8x8xf32> to vector<8xf32>
    %203 = vector.shape_cast %202 : vector<8xf32> to vector<8x1xf32>
    %204 = tpu.reciprocal %203 {approx = true} : vector<8x1xf32> -> vector<8x1xf32>
    %205 = vector.broadcast %204 : vector<8x1xf32> to vector<8x8xf32>
    %206 = arith.mulf %201, %205 : vector<8x8xf32>
    %207 = vector.extract_strided_slice %136 {offsets = [0, 24], sizes = [8, 8], strides = [1, 1]} : vector<8x32xf32> to vector<8x8xf32>
    %cst_48 = arith.constant dense<0.000000e+00> : vector<8x8xf32>
    %208 = tpu.matmul %206, %207, %cst_48 {dimension_numbers = #tpu.dot_dimension_numbers<[1], [0], [0], [1], [0, 0, 1, 1], [], []>} : vector<8x8xf32>, vector<8x8xf32>, vector<8x8xf32> -> vector<8x8xf32>
    %209 = tpu.concatenate %154, %172, %190, %208 in 1 : vector<8x8xf32>, vector<8x8xf32>, vector<8x8xf32>, vector<8x8xf32> -> vector<8x32xf32>
    %210 = tpu.concatenate %129, %209 in 0 : vector<8x32xf32>, vector<8x32xf32> -> vector<16x32xf32>
    %c0_49 = arith.constant 0 : index
    %c0_50 = arith.constant 0 : index
    %211 = vector.load %arg4[%c0_49, %c0_50] : memref<32x32xf32, #tpu.memory_space<vmem>>, vector<32x32xf32>
    %cst_51 = arith.constant dense<0.000000e+00> : vector<16x32xf32>
    %212 = tpu.matmul %210, %211, %cst_51 {dimension_numbers = #tpu.dot_dimension_numbers<[1], [0], [0], [1], [0, 0, 1, 1], [], []>} : vector<16x32xf32>, vector<32x32xf32>, vector<16x32xf32> -> vector<16x32xf32>
    %213 = vector.shape_cast %11 : vector<32xf32> to vector<1x32xf32>
    %214 = vector.broadcast %213 : vector<1x32xf32> to vector<16x32xf32>
    %215 = arith.addf %212, %214 : vector<16x32xf32>
    %216 = arith.addf %41, %215 : vector<16x32xf32>
    %cst_52 = arith.constant dense<0.000000e+00> : vector<16xf32>
    %217 = vector.multi_reduction <add>, %216, %cst_52 [1] : vector<16x32xf32> to vector<16xf32>
    %218 = vector.shape_cast %217 : vector<16xf32> to vector<16x1xf32>
    %cst_53 = arith.constant 3.200000e+01 : f32
    %219 = vector.broadcast %cst_53 : f32 to vector<16x1xf32>
    %220 = arith.divf %218, %219 : vector<16x1xf32>
    %221 = vector.broadcast %220 : vector<16x1xf32> to vector<16x32xf32>
    %222 = arith.subf %216, %221 : vector<16x32xf32>
    %223 = arith.mulf %222, %222 : vector<16x32xf32>
    %cst_54 = arith.constant dense<0.000000e+00> : vector<16xf32>
    %224 = vector.multi_reduction <add>, %223, %cst_54 [1] : vector<16x32xf32> to vector<16xf32>
    %225 = vector.shape_cast %224 : vector<16xf32> to vector<16x1xf32>
    %cst_55 = arith.constant 3.200000e+01 : f32
    %226 = vector.broadcast %cst_55 : f32 to vector<16x1xf32>
    %227 = arith.divf %225, %226 : vector<16x1xf32>
    %228 = vector.broadcast %220 : vector<16x1xf32> to vector<16x32xf32>
    %229 = arith.subf %216, %228 : vector<16x32xf32>
    %cst_56 = arith.constant 9.99999974E-6 : f32
    %230 = vector.broadcast %cst_56 : f32 to vector<16x1xf32>
    %231 = arith.addf %227, %230 : vector<16x1xf32>
    %232 = math.rsqrt %231 : vector<16x1xf32>
    %233 = vector.broadcast %232 : vector<16x1xf32> to vector<16x32xf32>
    %234 = arith.mulf %229, %233 : vector<16x32xf32>
    %235 = vector.shape_cast %7 : vector<32xf32> to vector<1x32xf32>
    %236 = vector.broadcast %235 : vector<1x32xf32> to vector<16x32xf32>
    %237 = arith.mulf %234, %236 : vector<16x32xf32>
    %238 = vector.shape_cast %9 : vector<32xf32> to vector<1x32xf32>
    %239 = vector.broadcast %238 : vector<1x32xf32> to vector<16x32xf32>
    %240 = arith.addf %237, %239 : vector<16x32xf32>
    %c0_57 = arith.constant 0 : index
    %c0_58 = arith.constant 0 : index
    %241 = vector.load %arg5[%c0_57, %c0_58] : memref<32x64xf32, #tpu.memory_space<vmem>>, vector<32x64xf32>
    %cst_59 = arith.constant dense<0.000000e+00> : vector<16x64xf32>
    %242 = tpu.matmul %240, %241, %cst_59 {dimension_numbers = #tpu.dot_dimension_numbers<[1], [0], [0], [1], [0, 0, 1, 1], [], []>} : vector<16x32xf32>, vector<32x64xf32>, vector<16x64xf32> -> vector<16x64xf32>
    %243 = vector.shape_cast %17 : vector<64xf32> to vector<1x64xf32>
    %244 = vector.broadcast %243 : vector<1x64xf32> to vector<16x64xf32>
    %245 = arith.addf %242, %244 : vector<16x64xf32>
    %cst_60 = arith.constant 0.000000e+00 : f32
    %246 = vector.broadcast %cst_60 : f32 to vector<16x64xf32>
    %247 = arith.maximumf %245, %246 : vector<16x64xf32>
    %c0_61 = arith.constant 0 : index
    %c0_62 = arith.constant 0 : index
    %248 = vector.load %arg6[%c0_61, %c0_62] : memref<64x32xf32, #tpu.memory_space<vmem>>, vector<64x32xf32>
    %cst_63 = arith.constant dense<0.000000e+00> : vector<16x32xf32>
    %249 = tpu.matmul %247, %248, %cst_63 {dimension_numbers = #tpu.dot_dimension_numbers<[1], [0], [0], [1], [0, 0, 1, 1], [], []>} : vector<16x64xf32>, vector<64x32xf32>, vector<16x32xf32> -> vector<16x32xf32>
    %250 = vector.shape_cast %13 : vector<32xf32> to vector<1x32xf32>
    %251 = vector.broadcast %250 : vector<1x32xf32> to vector<16x32xf32>
    %252 = arith.addf %249, %251 : vector<16x32xf32>
    %253 = arith.addf %240, %252 : vector<16x32xf32>
    %c0_64 = arith.constant 0 : index
    %c0_65 = arith.constant 0 : index
    %254 = vector.load %arg8[%c0_64, %c0_65] : memref<16x32xf32, #tpu.memory_space<vmem>>, vector<16x32xf32>
    tpu.vector_store %arg8[%c0_64, %c0_65], %253 {strides = array<i32>} : memref<16x32xf32, #tpu.memory_space<vmem>>, vector<16x32xf32>,
    return
  }
  func.func @transform_0(%arg0: i32) -> (i32, i32) {
    %c0_i32 = arith.constant 0 : i32
    %c0_i32_0 = arith.constant 0 : i32
    return %arg0, %c0_i32 : i32, i32
  }
  func.func @transform_1(%arg0: i32) -> (i32, i32, i32) {
    %c0_i32 = arith.constant 0 : i32
    %c0_i32_0 = arith.constant 0 : i32
    %c0_i32_1 = arith.constant 0 : i32
    return %arg0, %c0_i32, %c0_i32_0 : i32, i32, i32
  }
  func.func @transform_2(%arg0: i32) -> (i32, i32) {
    %c0_i32 = arith.constant 0 : i32
    %c0_i32_0 = arith.constant 0 : i32
    %c0_i32_1 = arith.constant 0 : i32
    return %c0_i32, %c0_i32_0 : i32, i32
  }
  func.func @transform_3(%arg0: i32) -> (i32, i32) {
    %c0_i32 = arith.constant 0 : i32
    %c0_i32_0 = arith.constant 0 : i32
    %c0_i32_1 = arith.constant 0 : i32
    return %c0_i32, %c0_i32_0 : i32, i32
  }
  func.func @transform_4(%arg0: i32) -> (i32, i32) {
    %c0_i32 = arith.constant 0 : i32
    %c0_i32_0 = arith.constant 0 : i32
    %c0_i32_1 = arith.constant 0 : i32
    return %c0_i32, %c0_i32_0 : i32, i32
  }
  func.func @transform_5(%arg0: i32) -> (i32, i32) {
    %c0_i32 = arith.constant 0 : i32
    %c0_i32_0 = arith.constant 0 : i32
    %c0_i32_1 = arith.constant 0 : i32
    return %c0_i32, %c0_i32_0 : i32, i32
  }
  func.func @transform_6(%arg0: i32) -> (i32, i32) {
    %c0_i32 = arith.constant 0 : i32
    %c0_i32_0 = arith.constant 0 : i32
    %c0_i32_1 = arith.constant 0 : i32
    return %c0_i32, %c0_i32_0 : i32, i32
  }
  func.func @transform_7(%arg0: i32) -> (i32, i32) {
    %c0_i32 = arith.constant 0 : i32
    %c0_i32_0 = arith.constant 0 : i32
    return %arg0, %c0_i32 : i32, i32
  }
}

</mosaic_0001>

<bundles_post_ra>
// kernel: tpu_custom_call.1
= control target key start
LH: loop header
LB: loop body
LE: loop exit
PB: predicated region body
PF: predicated region fallthrough
CT: control target
= control target key end

     0   :  { %12 = vsyncpa [#allocation3], 0  ;;  %s1431_s0 = inlined_call_operand.hbm [shape: f32[16,32], index: 0, kind: input, shape index: {}]   ;;  %s1432_s1 = inlined_call_operand.hbm [shape: f32[2,1,8], index: 1, kind: input, shape index: {}]   ;;  %s1433_s2 = inlined_call_operand.vmem [shape: f32[32,96], index: 2, kind: input, shape index: {}]   ;;  %s1434_s3 = inlined_call_operand.vmem [shape: f32[32,32], index: 3, kind: input, shape index: {}]   ;;  %s1435_s4 = inlined_call_operand.vmem [shape: f32[32,64], index: 4, kind: input, shape index: {}]   ;;  %s1436_s5 = inlined_call_operand.vmem [shape: f32[64,32], index: 5, kind: input, shape index: {}]   ;;  %s1437_s6 = inlined_call_operand.hbm [shape: f32[8,128], index: 6, kind: input, shape index: {}]   ;;  %s1438_s7 = inlined_call_operand.hbm [shape: f32[16,32], index: 7, kind: output, shape index: {}]  }
   0x1   :  { %13 = vsyncpa [#allocation6], 0  ;;  %s32_s26 = sshll.u32 %s1432_s1, 4  ;;  %s33_s26 = int_to_ptr.hbm [resolvable:$true] %s32_s26 }
   0x2   :  { %14 = vsyncpa [#allocation4], 0  ;;  %s1111_s27 = smov [#allocation5]   ;;  %s19_s8 = sshll.u32 %s1431_s0, 4  ;;  %s20_s8 = int_to_ptr.hbm [resolvable:$true] %s19_s8 }
   0x3   :  { %s34_s28 = sshll.u32 %s1111_s27, 4  ;;  %s1112_s9 = smov 16   ;;  %s35_s28 = int_to_ptr.vmem [resolvable:$true] %s34_s28 }
   0x4   :  { %s1113_s10 = smov 1   ;;  %s1114_s11 = smov [#allocation2]  }
   0x5   :  { %40 = dma.hbm_to_vmem [thread:$0]  %s33_s26, 32, %s35_s28, [#allocation6], %s1112_s9, %s1112_s9, %s1113_s10  }
   0x6   :  { %s21_s12 = sshll.u32 %s1114_s11, 4  ;;  %s1115_s13 = smov 128   ;;  %s22_s12 = int_to_ptr.vmem [resolvable:$true] %s21_s12 }
   0x7   :  { %s1116_s1 = smov 8   ;;  %s54_s16 = sshll.u32 %s1437_s6, 4  ;;  %s55_s16 = int_to_ptr.hbm [resolvable:$true] %s54_s16 }
   0x8   :  { %27 = dma.hbm_to_vmem [thread:$0]  %s20_s8, 256, %s22_s12, [#allocation3], %s1115_s13, %s1115_s13, %s1116_s1  }
   0x9   :  { %s1117_s0 = smov [#allocation7]  }
   0xa   :  { %s56_s17 = sshll.u32 %s1117_s0, 4  ;;  %s57_s17 = int_to_ptr.vmem [resolvable:$true] %s56_s17 }
   0xb   :  { %59 = dma.hbm_to_vmem [thread:$0]  %s55_s16, 128, %s57_s17, [#allocation6]  }
   0xc   :  { %1105 = dma.done.wait [#allocation3], 256  }
   0xd   :  { %1106 = vsyncadd [#allocation3], 4294967040 }
   0xe   :  { %1107 = dma.done.wait [#allocation6], 160  }
   0xf   :  { %1108 = vsyncadd [#allocation6], 4294967136  ;;  %vm75_vm0 = vcmask 261120   ;;  %v72_v0 = vld [vmem:[#allocation2] sm:$0xff]  ;;  %v1118_v2 = vmov 32.0   ;;  %v136_v14 = vld [vmem:[%s1433_s2 + $0x18] sm:$0xff] }
  0x10   :  { %v76_v1 = vsel %vm75_vm0, %v72_v0, 0.0  ;;  %967 = vrcp.f32 %v1118_v2  ;;  %156 = vmatpush.msra.mxu0 %v136_v14  ;;  %v135_v15 = vld [vmem:[%s1433_s2 + $0x10] sm:$0xff]  ;;  %v134_v16 = vld [vmem:[%s1433_s2 + $0x8] sm:$0xff]  ;;  %v133_v17 = vld [vmem:[%s1433_s2] sm:$0xff]  ;;  %s1119_s2 = smov 120   ;;  %s1120_s25 = smov 88  }
  0x11   :  { %77 = vadd.xlane.f32.xlu0 %v76_v1  ;;  %v1204_v26 = vld [vmem:[#allocation7] sm:$0xff]  ;;  %s1121_s26 = smov 96   ;;  %s1122_s27 = smov 64   ;;  %v73_v37 = vld [vmem:[#allocation2 + $0x8] sm:$0xff]  ;;  %vm175_vm5 = vcmask 64512   ;;  %vm445_vm9 = vcmask 130048  }
  0x12   :  { %157 = vmatpush.msra.mxu0 %v135_v15  ;;  %v127_v28 = vperm.slane %v1204_v26, 0  ;;  %v130_v31 = vperm.slane %v1204_v26, 1  ;;  %v137_v34 = vperm.slane %v1204_v26, 6  ;;  %s1123_s28 = smov 80   ;;  %v79_v38 = vsel %vm75_vm0, %v73_v37, 0.0  ;;  %s1124_s29 = smov 56  }
  0x13   :  { %s1125_s30 = smov 104   ;;  %v167_v46 = vld [vmem:[#allocation5] sm:$0x1]  ;;  %s1126_s8 = smov 72   ;;  %vm447_vm10 = vcmask 195584   ;;  %vm860_vm14 = vcmask 523264  }
  0x14   :  { %158 = vmatpush.msra.mxu0 %v134_v16  ;;  %v168_v47 = vmul.f32 -1e+30, %v167_v46  ;;  %s1127_s10 = smov 112   ;;  %s1128_s11 = smov 48  }
  0x15   :  { %s1129_s12 = smov 40   ;;  %s1130_s14 = smov 24  }
  0x16   :  { %v968_v3 = vpop.eup %967  ;;  %159 = vmatpush.msra.mxu0 %v133_v17  ;;  %v1243_v49 = vperm.slane %v168_v47, 0 }
  0x17   :  { %v83_v4 = vmul.f32 32.0, %v968_v3  ;;  %vm87_vm1 = vweird.f32 %v968_v3 }
  0x19   :  { %v84_v5 = vsub.f32 1.0, %v83_v4 }
  0x1b   :  { %v85_v6 = vmul.f32 %v968_v3, %v84_v5 }
  0x1d   :  { %v86_v7 = vadd.f32 %v968_v3, %v85_v6 }
  0x1f   :  { %v1187_v8 = vsel %vm87_vm1, %v968_v3, %v86_v7 }
  0x84   :  { %v78_v9 = vpop.xlane.xlu0 %77 }
  0x85   :  { %v89_v10 = vmul.f32 %v1187_v8, %v78_v9 }
  0x87   :  { %v91_v11 = vsub.f32 %v72_v0, %v89_v10 }
  0x89   :  { %v93_v12 = vmul.f32 %v91_v11, %v91_v11 }
  0x8b   :  { %v95_v13 = vsel %vm75_vm0, %v93_v12, 0.0 }
  0x8c   :  { %96 = vadd.xlane.f32.xlu0 %v95_v13 }
  0xff   :  { %v97_v18 = vpop.xlane.xlu0 %96 }
 0x100   :  { %v101_v19 = vmul.f32 %v97_v18, %v1187_v8 }
 0x102   :  { %v103_v20 = vadd.f32 1e-05, %v101_v19 }
 0x104   :  { %969 = vrsqrt.f32 %v103_v20  ;;  %vm111_vm3 = vweird.f32 %v103_v20 }
 0x10a   :  { %v970_v21 = vpop.eup %969 }
 0x10b   :  { %v106_v22 = vmul.f32 %v970_v21, %v103_v20  ;;  %vm112_vm2 = vweird.f32 %v970_v21 }
 0x10c   :  { %vm113_vm4 = vmor %vm111_vm3, %vm112_vm2 }
 0x10d   :  { %v107_v23 = vmul.f32 %v970_v21, %v106_v22 }
 0x10f   :  { %v108_v24 = vmul.f32 0.5, %v107_v23 }
 0x111   :  { %v109_v25 = vsub.f32 1.5, %v108_v24 }
 0x113   :  { %v110_v27 = vmul.f32 %v970_v21, %v109_v25 }
 0x115   :  { %v114_v29 = vsel %vm113_vm4, %v970_v21, %v110_v27 }
 0x116   :  { %v125_v30 = vmul.f32 %v114_v29, %v91_v11 }
 0x118   :  { %v128_v32 = vmul.f32 %v127_v28, %v125_v30 }
 0x11a   :  { %v1212_v33 = vadd.f32 %v130_v31, %v128_v32 }
 0x11c   :  { %914 = vmatmul.msk.f32.vlgmr.msra.gmra.mxu0 %vm75_vm0, %v1212_v33 }
 0x199   :  { %v161_v35 = vpop.f32.mrf.mxu0 }
 0x19a   :  { %v1219_v36 = vadd.f32 %v161_v35, %v137_v34 }
 0x19c   :  { %237 = vrot.lane.b32.xlu0 %v1219_v36, %s1119_s2  ;;  %239 = vrot.lane.b32.xlu2 %v1219_v36, %s1120_s25 }
 0x19d   :  { %173 = vrot.lane.b32.xlu1 %v1219_v36, %s1121_s26 }
 0x1a4   :  { %211 = vrot.lane.b32.xlu2 %v1219_v36, %s1122_s27 }
 0x1ac   :  { %304 = vrot.lane.b32.xlu2 %v1219_v36, %s1123_s28 }
 0x1c6   :  { %80 = vadd.xlane.f32.xlu0 %v79_v38 }
 0x1da   :  { %276 = vrot.lane.b32.xlu0 %v1219_v36, %s1124_s29 }
 0x1e2   :  { %367 = vrot.lane.b32.xlu0 %v1219_v36, %s1125_s30 }
 0x1f6   :  { %v240_v39 = vpop.permute.xlu2 %239 }
 0x1f7   :  { %919 = vmatpush.xpose.msk.msra.mxu3 %vm175_vm5, %v240_v39 }
 0x1fe   :  { %v212_v40 = vpop.permute.xlu2 %211 }
 0x206   :  { %v305_v43 = vpop.permute.xlu2 %304 }
 0x20e   :  { %v238_v41 = vpop.permute.xlu0 %237 }
 0x20f   :  { %v174_v42 = vpop.permute.xlu1 %173  ;;  %920 = vmatmul.msk.f32.vlgmr.msra.gmra.mxu3 %vm175_vm5, %v238_v41 }
 0x210   :  { %916 = vmatpush.xpose.msk.msra.mxu1 %vm175_vm5, %v174_v42 }
 0x213   :  { %917 = vmatmul.msk.f32.vlgmr.msra.gmra.mxu1 %vm175_vm5, %v1219_v36 }
 0x214   :  { %232 = vmatpush.msrb.mxu1 %v212_v40 }
 0x216   :  { %922 = vmatpush.xpose.msk.msra.mxu1 %vm175_vm5, %v305_v43 }
 0x239   :  { %v81_v44 = vpop.xlane.xlu0 %80 }
 0x23a   :  { %v90_v48 = vmul.f32 %v1187_v8, %v81_v44 }
 0x23c   :  { %v92_v51 = vsub.f32 %v73_v37, %v90_v48  ;;  %v450_v48 = vld [vmem:[#allocation5 + $0x1] sm:$0x1] }
 0x23e   :  { %v94_v54 = vmul.f32 %v92_v51, %v92_v51 }
 0x240   :  { %v98_v55 = vsel %vm75_vm0, %v94_v54, 0.0 }
 0x24c   :  { %v277_v45 = vpop.permute.xlu0 %276 }
 0x24d   :  { %297 = vmatpush.msra.mxu2 %v277_v45 }
 0x254   :  { %v368_v30 = vpop.permute.xlu0 %367 }
 0x290   :  { %v197_v50 = vpop.f32.mrf.mxu1 }
 0x291   :  { %v198_v52 = vadd.f32 %v197_v50, %v1243_v49 }
 0x292   :  { %v262_v12 = vpop.f32.mrf.mxu3 }
 0x293   :  { %v200_v53 = vsel %vm175_vm5, %v198_v52, -inf  ;;  %v263_v13 = vadd.f32 %v262_v12, %v1243_v49 }
 0x294   :  { %201 = vmax.xlane.f32.xlu1 %v200_v53 }
 0x295   :  { %v265_v14 = vsel %vm175_vm5, %v263_v13, -inf }
 0x29c   :  { %99 = vadd.xlane.f32.xlu1 %v98_v55 }
 0x2b5   :  { %369 = vrot.lane.b32.xlu1 %v1219_v36, %s1126_s8 }
 0x307   :  { %v202_v56 = vpop.xlane.xlu1 %201 }
 0x308   :  { %v203_v57 = vsub.f32 %v198_v52, %v202_v56  ;;  %v451_v52 = vmul.f32 -1e+30, %v450_v48  ;;  %v731_v48 = vld [vmem:[%s1434_s3 + $0x10] sm:$0xff] }
 0x30a   :  { %v204_v58 = vmul.f32 1.442695, %v203_v57  ;;  %v1299_v54 = vperm.slane %v451_v52, 0 }
 0x30c   :  { %971 = vpow2.f32 %v204_v58 }
 0x30f   :  { %v100_v59 = vpop.xlane.xlu1 %99 }
 0x310   :  { %v102_v60 = vmul.f32 %v100_v59, %v1187_v8 }
 0x312   :  { %v972_v61 = vpop.eup %971  ;;  %v104_v62 = vadd.f32 1e-05, %v102_v60 }
 0x313   :  { %v206_v63 = vsel %vm175_vm5, %v972_v61, 0.0 }
 0x314   :  { %973 = vrsqrt.f32 %v104_v62  ;;  %207 = vadd.xlane.f32.xlu2 %v206_v63  ;;  %vm121_vm6 = vweird.f32 %v104_v62 }
 0x31a   :  { %v974_v0 = vpop.eup %973 }
 0x31b   :  { %v116_v1 = vmul.f32 %v974_v0, %v104_v62  ;;  %vm122_vm7 = vweird.f32 %v974_v0 }
 0x31c   :  { %vm123_vm8 = vmor %vm121_vm6, %vm122_vm7 }
 0x31d   :  { %v117_v2 = vmul.f32 %v974_v0, %v116_v1 }
 0x31f   :  { %v118_v3 = vmul.f32 0.5, %v117_v2 }
 0x321   :  { %v119_v4 = vsub.f32 1.5, %v118_v3 }
 0x323   :  { %v120_v5 = vmul.f32 %v974_v0, %v119_v4 }
 0x325   :  { %v124_v6 = vsel %vm123_vm8, %v974_v0, %v120_v5 }
 0x326   :  { %v126_v7 = vmul.f32 %v124_v6, %v92_v51 }
 0x327   :  { %v370_v9 = vpop.permute.xlu1 %369 }
 0x328   :  { %925 = vmatpush.xpose.msk.msrb.mxu2 %vm175_vm5, %v370_v9  ;;  %v129_v10 = vmul.f32 %v127_v28, %v126_v7 }
 0x32a   :  { %v1257_v11 = vadd.f32 %v130_v31, %v129_v10 }
 0x32c   :  { %302 = vrot.lane.b32.xlu2 %v1219_v36, %s1127_s10  ;;  %915 = vmatmul.msk.f32.gmra.mxu0 %vm75_vm0, %v1257_v11 }
 0x355   :  { %266 = vmax.xlane.f32.xlu2 %v265_v14 }
 0x36d   :  { %341 = vrot.lane.b32.xlu2 %v1219_v36, %s1128_s11 }
 0x387   :  { %v208_v15 = vpop.xlane.xlu2 %207 }
 0x388   :  { %975 = vrcp.f32 %v208_v15 }
 0x38e   :  { %v976_v16 = vpop.eup %975 }
 0x38f   :  { %v210_v17 = vmul.f32 %v976_v16, %v972_v61  ;;  %v303_v18 = vpop.permute.xlu2 %302 }
 0x391   :  { %918 = vmatmul.msk.f32.vlgmr.msrb.gmra.mxu1 %vm175_vm5, %v210_v17 }
 0x399   :  { %923 = vmatmul.msk.f32.vlgmr.msra.gmra.mxu1 %vm175_vm5, %v303_v18 }
 0x3a9   :  { %v164_v19 = vpop.f32.mrf.mxu0 }
 0x3aa   :  { %v1270_v20 = vadd.f32 %v164_v19, %v137_v34 }
 0x3ac   :  { %651 = vrot.lane.b32.xlu2 %v1270_v20, %s1126_s8  ;;  %521 = vrot.lane.b32.xlu1 %v1270_v20, %s1120_s25 }
 0x3ad   :  { %456 = vrot.lane.b32.xlu0 %v1270_v20, %s1121_s26 }
 0x3b5   :  { %519 = vrot.lane.b32.xlu0 %v1270_v20, %s1119_s2 }
 0x3bd   :  { %584 = vrot.lane.b32.xlu0 %v1270_v20, %s1127_s10 }
 0x3c8   :  { %v267_v21 = vpop.xlane.xlu2 %266 }
 0x3c9   :  { %v268_v22 = vsub.f32 %v263_v13, %v267_v21 }
 0x3cb   :  { %v269_v23 = vmul.f32 1.442695, %v268_v22 }
 0x3cd   :  { %977 = vpow2.f32 %v269_v23 }
 0x3d0   :  { %v342_v24 = vpop.permute.xlu2 %341 }
 0x3d1   :  { %362 = vmatpush.msrb.mxu3 %v342_v24 }
 0x3d3   :  { %v978_v25 = vpop.eup %977 }
 0x3d4   :  { %v271_v27 = vsel %vm175_vm5, %v978_v25, 0.0 }
 0x3d6   :  { %272 = vadd.xlane.f32.xlu1 %v271_v27 }
 0x406   :  { %v652_v40 = vpop.permute.xlu2 %651 }
 0x40e   :  { %v1282_v28 = vpop.f32.mrf.mxu1 }
 0x416   :  { %v327_v29 = vpop.f32.mrf.mxu1 }
 0x417   :  { %v328_v31 = vadd.f32 %v327_v29, %v1243_v49 }
 0x419   :  { %v330_v32 = vsel %vm175_vm5, %v328_v31, -inf }
 0x41a   :  { %331 = vmax.xlane.f32.xlu1 %v330_v32 }
 0x41e   :  { %v522_v35 = vpop.permute.xlu1 %521 }
 0x41f   :  { %v457_v34 = vpop.permute.xlu0 %456 }
 0x420   :  { %928 = vmatpush.xpose.msk.msra.mxu3 %vm175_vm5, %v457_v34 }
 0x427   :  { %v520_v41 = vpop.permute.xlu0 %519 }
 0x42f   :  { %v585_v62 = vpop.permute.xlu0 %584 }
 0x433   :  { %586 = vrot.lane.b32.xlu1 %v1270_v20, %s1123_s28 }
 0x449   :  { %v273_v37 = vpop.xlane.xlu1 %272 }
 0x44a   :  { %979 = vrcp.f32 %v273_v37 }
 0x450   :  { %v980_v38 = vpop.eup %979 }
 0x451   :  { %v275_v39 = vmul.f32 %v980_v38, %v978_v25 }
 0x453   :  { %921 = vmatmul.msk.f32.vlgmr.msra.gmra.mxu2 %vm175_vm5, %v275_v39 }
 0x454   :  { %931 = vmatpush.xpose.msk.msra.mxu2 %vm175_vm5, %v522_v35 }
 0x45b   :  { %926 = vmatmul.msk.f32.vlgmr.msrb.gmra.mxu2 %vm175_vm5, %v368_v30 }
 0x45c   :  { %937 = vmatpush.xpose.msk.msrb.mxu2 %vm175_vm5, %v652_v40 }
 0x463   :  { %932 = vmatmul.msk.f32.vlgmr.msra.gmra.mxu2 %vm175_vm5, %v520_v41 }
 0x48d   :  { %v332_v42 = vpop.xlane.xlu1 %331 }
 0x48e   :  { %v333_v43 = vsub.f32 %v328_v31, %v332_v42 }
 0x490   :  { %v334_v44 = vmul.f32 1.442695, %v333_v43 }
 0x492   :  { %981 = vpow2.f32 %v334_v44 }
 0x498   :  { %v982_v45 = vpop.eup %981 }
 0x499   :  { %v336_v46 = vsel %vm175_vm5, %v982_v45, 0.0 }
 0x49a   :  { %337 = vadd.xlane.f32.xlu1 %v336_v46 }
 0x4a5   :  { %v587_v58 = vpop.permute.xlu1 %586 }
 0x4b3   :  { %649 = vrot.lane.b32.xlu1 %v1270_v20, %s1125_s30 }
 0x4d6   :  { %v299_v47 = vpop.f32.mrf.mxu2 }
 0x4de   :  { %v392_v50 = vpop.f32.mrf.mxu2 }
 0x4df   :  { %v393_v51 = vadd.f32 %v392_v50, %v1243_v49  ;;  %v730_v50 = vld [vmem:[%s1434_s3 + $0x8] sm:$0xff] }
 0x4e1   :  { %v395_v53 = vsel %vm175_vm5, %v393_v51, -inf }
 0x4e2   :  { %396 = vmax.xlane.f32.xlu2 %v395_v53 }
 0x4e6   :  { %v544_v55 = vpop.f32.mrf.mxu2 }
 0x4e7   :  { %v545_v56 = vadd.f32 %v544_v55, %v1299_v54 }
 0x4e9   :  { %v547_v57 = vsel %vm175_vm5, %v545_v56, -inf }
 0x4ea   :  { %548 = vmax.xlane.f32.xlu1 %v547_v57 }
 0x50d   :  { %v338_v59 = vpop.xlane.xlu1 %337 }
 0x50e   :  { %983 = vrcp.f32 %v338_v59 }
 0x514   :  { %v984_v60 = vpop.eup %983 }
 0x515   :  { %v340_v61 = vmul.f32 %v984_v60, %v982_v45 }
 0x517   :  { %924 = vmatmul.msk.f32.vlgmr.msrb.gmra.mxu3 %vm175_vm5, %v340_v61 }
 0x518   :  { %934 = vmatpush.xpose.msk.msrb.mxu3 %vm175_vm5, %v587_v58 }
 0x51f   :  { %929 = vmatmul.msk.f32.vlgmr.msra.gmra.mxu3 %vm175_vm5, %v1270_v20 }
 0x525   :  { %v650_v49 = vpop.permute.xlu1 %649 }
 0x526   :  { %938 = vmatmul.msk.f32.vlgmr.msrb.gmra.mxu2 %vm175_vm5, %v650_v49 }
 0x527   :  { %935 = vmatmul.msk.f32.vlgmr.msrb.gmra.mxu3 %vm175_vm5, %v585_v62 }
 0x555   :  { %v397_v63 = vpop.xlane.xlu2 %396 }
 0x556   :  { %v398_v0 = vsub.f32 %v393_v51, %v397_v63 }
 0x558   :  { %v399_v1 = vmul.f32 1.442695, %v398_v0 }
 0x55a   :  { %985 = vpow2.f32 %v399_v1 }
 0x55d   :  { %v549_v5 = vpop.xlane.xlu1 %548 }
 0x55e   :  { %v550_v9 = vsub.f32 %v545_v56, %v549_v5  ;;  %v729_v56 = vld [vmem:[%s1434_s3] sm:$0xff] }
 0x560   :  { %v986_v2 = vpop.eup %985  ;;  %v551_v12 = vmul.f32 1.442695, %v550_v9 }
 0x561   :  { %v401_v3 = vsel %vm175_vm5, %v986_v2, 0.0 }
 0x562   :  { %402 = vadd.xlane.f32.xlu1 %v401_v3  ;;  %987 = vpow2.f32 %v551_v12 }
 0x568   :  { %v1318_v15 = vpop.eup %987 }
 0x569   :  { %v553_v16 = vsel %vm175_vm5, %v1318_v15, 0.0 }
 0x57b   :  { %406 = vrot.lane.b32.xlu1 %v1219_v36, %s1129_s12 }
 0x583   :  { %623 = vrot.lane.b32.xlu1 %v1270_v20, %s1128_s11 }
 0x58b   :  { %433 = vrot.lane.b32.xlu1 %v299_v47, %s1116_s1  ;;  %v732_v47 = vld [vmem:[%s1434_s3 + $0x18] sm:$0xff]  ;;  %s900_s3 = sshll.u32 %s1438_s7, 4  ;;  %s901_s3 = int_to_ptr.hbm [resolvable:$true] %s900_s3 }
 0x58c   :  { %752 = vmatpush.msra.mxu3 %v732_v47 }
 0x58e   :  { %753 = vmatpush.msra.mxu3 %v731_v48 }
 0x590   :  { %754 = vmatpush.msra.mxu3 %v730_v50  ;;  %v812_v50 = vperm.slane %v1204_v26, 3 }
 0x592   :  { %755 = vmatpush.msra.mxu3 %v729_v56  ;;  %v855_v56 = vld [vmem:[%s1436_s5 + $0x20] sm:$0xff] }
 0x59a   :  { %v364_v4 = vpop.f32.mrf.mxu3 }
 0x5a2   :  { %v479_v6 = vpop.f32.mrf.mxu3 }
 0x5a3   :  { %v480_v7 = vadd.f32 %v479_v6, %v1299_v54 }
 0x5a5   :  { %v482_v10 = vsel %vm175_vm5, %v480_v7, -inf }
 0x5a6   :  { %483 = vmax.xlane.f32.xlu0 %v482_v10  ;;  %v733_v10 = vperm.slane %v1204_v26, 4 }
 0x5a9   :  { %v674_v13 = vpop.f32.mrf.mxu2 }
 0x5aa   :  { %v675_v14 = vadd.f32 %v674_v13, %v1299_v54  ;;  %v609_v31 = vpop.f32.mrf.mxu3 }
 0x5ab   :  { %v610_v34 = vadd.f32 %v609_v31, %v1299_v54 }
 0x5ac   :  { %v677_v36 = vsel %vm175_vm5, %v675_v14, -inf }
 0x5ad   :  { %v612_v37 = vsel %vm175_vm5, %v610_v34, -inf }
 0x5ae   :  { %678 = vmax.xlane.f32.xlu0 %v677_v36 }
 0x5b6   :  { %554 = vadd.xlane.f32.xlu0 %v553_v16 }
 0x5ca   :  { %493 = vrot.lane.b32.xlu0 %v1270_v20, %s1122_s27 }
 0x5d2   :  { %688 = vrot.lane.b32.xlu0 %v1270_v20, %s1129_s12 }
 0x5d5   :  { %v403_v17 = vpop.xlane.xlu1 %402 }
 0x5d6   :  { %989 = vrcp.f32 %v403_v17 }
 0x5da   :  { %437 = vrot.lane.b32.xlu0 %v364_v4, %s1112_s9 }
 0x5dc   :  { %v990_v18 = vpop.eup %989 }
 0x5dd   :  { %v405_v19 = vmul.f32 %v990_v18, %v986_v2 }
 0x5ed   :  { %v407_v21 = vpop.permute.xlu1 %406 }
 0x5ee   :  { %427 = vmatpush.msrb.mxu1 %v407_v21 }
 0x5ef   :  { %927 = vmatmul.msk.f32.vlgmr.msrb.gmra.mxu1 %vm175_vm5, %v405_v19 }
 0x5f5   :  { %v624_v40 = vpop.permute.xlu1 %623 }
 0x5fd   :  { %v434_v58 = vpop.permute.xlu1 %433 }
 0x5fe   :  { %v444_v60 = vsel %vm175_vm5, %v1282_v28, %v434_v58 }
 0x619   :  { %v484_v22 = vpop.xlane.xlu0 %483 }
 0x61a   :  { %v485_v29 = vsub.f32 %v480_v7, %v484_v22 }
 0x61c   :  { %v486_v32 = vmul.f32 1.442695, %v485_v29 }
 0x621   :  { %v679_v23 = vpop.xlane.xlu0 %678 }
 0x622   :  { %v680_v24 = vsub.f32 %v675_v14, %v679_v23 }
 0x624   :  { %v681_v25 = vmul.f32 1.442695, %v680_v24 }
 0x626   :  { %991 = vpow2.f32 %v681_v25 }
 0x627   :  { %993 = vpow2.f32 %v486_v32  ;;  %v818_v32 = vld [vmem:[%s1435_s4 + $0x18] sm:$0xff] }
 0x629   :  { %v555_v35 = vpop.xlane.xlu0 %554 }
 0x62c   :  { %v1327_v27 = vpop.eup %991 }
 0x62d   :  { %v683_v30 = vsel %vm175_vm5, %v1327_v27, 0.0  ;;  %v994_v38 = vpop.eup %993 }
 0x62e   :  { %684 = vadd.xlane.f32.xlu2 %v683_v30  ;;  %v488_v41 = vsel %vm175_vm5, %v994_v38, 0.0 }
 0x636   :  { %613 = vmax.xlane.f32.xlu2 %v612_v37 }
 0x63c   :  { %v494_v39 = vpop.permute.xlu0 %493 }
 0x63d   :  { %514 = vmatpush.msrb.mxu0 %v494_v39 }
 0x63e   :  { %489 = vadd.xlane.f32.xlu2 %v488_v41 }
 0x63f   :  { %644 = vmatpush.msra.mxu0 %v624_v40 }
 0x644   :  { %v689_v57 = vpop.permute.xlu0 %688 }
 0x64c   :  { %v438_v59 = vpop.permute.xlu0 %437 }
 0x64d   :  { %v446_v61 = vsel %vm445_vm9, %v444_v60, %v438_v59 }
 0x66c   :  { %v429_v42 = vpop.f32.mrf.mxu1 }
 0x66d   :  { %441 = vrot.lane.b32.xlu1 %v429_v42, %s1130_s14 }
 0x6a1   :  { %v685_v43 = vpop.xlane.xlu2 %684 }
 0x6a9   :  { %v614_v44 = vpop.xlane.xlu2 %613 }
 0x6aa   :  { %v615_v45 = vsub.f32 %v610_v34, %v614_v44  ;;  %v817_v34 = vld [vmem:[%s1435_s4 + $0x10] sm:$0xff] }
 0x6ac   :  { %v616_v46 = vmul.f32 1.442695, %v615_v45 }
 0x6ae   :  { %995 = vpow2.f32 %v616_v46  ;;  %v809_v46 = vperm.slane %v1204_v26, 2 }
 0x6b1   :  { %v490_v51 = vpop.xlane.xlu2 %489 }
 0x6b2   :  { %997 = vrcp.f32 %v490_v51 }
 0x6b3   :  { %999 = vrcp.f32 %v555_v35  ;;  %v816_v35 = vld [vmem:[%s1435_s4 + $0x8] sm:$0xff] }
 0x6b4   :  { %v996_v52 = vpop.eup %995 }
 0x6b5   :  { %v618_v53 = vsel %vm175_vm5, %v996_v52, 0.0 }
 0x6b6   :  { %619 = vadd.xlane.f32.xlu2 %v618_v53  ;;  %v858_v53 = vld [vmem:[%s1436_s5 + $0x38] sm:$0xff] }
 0x6b7   :  { %875 = vmatpush.msra.mxu2 %v858_v53 }
 0x6b8   :  { %v998_v54 = vpop.eup %997 }
 0x6b9   :  { %v492_v55 = vmul.f32 %v998_v54, %v994_v38  ;;  %v1000_v0 = vpop.eup %999  ;;  %v857_v54 = vld [vmem:[%s1436_s5 + $0x30] sm:$0xff] }
 0x6ba   :  { %v557_v1 = vmul.f32 %v1000_v0, %v1318_v15  ;;  %876 = vmatpush.msra.mxu2 %v857_v54  ;;  %v851_v0 = vld [vmem:[%s1436_s5] sm:$0xff] }
 0x6bb   :  { %930 = vmatmul.msk.f32.vlgmr.msrb.gmra.mxu0 %vm175_vm5, %v492_v55  ;;  %v856_v55 = vld [vmem:[%s1436_s5 + $0x28] sm:$0xff] }
 0x6bc   :  { %838 = vmatpush.msrb.mxu0 %v818_v32  ;;  %877 = vmatpush.msra.mxu2 %v856_v55 }
 0x6be   :  { %839 = vmatpush.msrb.mxu0 %v817_v34  ;;  %878 = vmatpush.msra.mxu2 %v855_v56 }
 0x6c0   :  { %840 = vmatpush.msrb.mxu0 %v816_v35 }
 0x6ce   :  { %558 = vrot.lane.b32.xlu2 %v1270_v20, %s1124_s29 }
 0x6df   :  { %v442_v49 = vpop.permute.xlu1 %441 }
 0x6e0   :  { %v448_v62 = vsel %vm447_vm10, %v446_v61, %v442_v49 }
 0x6e1   :  { %940 = vmatmul.msk.f32.vlgmr.msra.gmra.mxu3 %vm75_vm0, %v448_v62  ;;  %v853_v62 = vld [vmem:[%s1436_s5 + $0x10] sm:$0xff] }
 0x729   :  { %v620_v63 = vpop.xlane.xlu2 %619 }
 0x72a   :  { %1001 = vrcp.f32 %v620_v63  ;;  %v852_v63 = vld [vmem:[%s1436_s5 + $0x8] sm:$0xff] }
 0x72b   :  { %1003 = vrcp.f32 %v685_v43 }
 0x730   :  { %v1002_v20 = vpop.eup %1001 }
 0x731   :  { %v622_v2 = vmul.f32 %v1002_v20, %v996_v52  ;;  %v559_v3 = vpop.permute.xlu2 %558  ;;  %v1004_v28 = vpop.eup %1003  ;;  %v819_v20 = vperm.slane %v1204_v26, 7 }
 0x732   :  { %579 = vmatpush.msra.mxu1 %v559_v3  ;;  %v687_v4 = vmul.f32 %v1004_v28, %v1327_v27 }
 0x733   :  { %933 = vmatmul.msk.f32.vlgmr.msra.gmra.mxu1 %vm175_vm5, %v557_v1  ;;  %936 = vmatmul.msk.f32.vlgmr.msra.gmra.mxu0 %vm175_vm5, %v622_v2 }
 0x734   :  { %709 = vmatpush.msrb.mxu1 %v689_v57  ;;  %v854_v57 = vld [vmem:[%s1436_s5 + $0x18] sm:$0xff]  ;;  %s1131_s5 = smov [#allocation8]  }
 0x735   :  { %879 = vmatpush.msra.mxu2 %v854_v57  ;;  %s898_s18 = sshll.u32 %s1131_s5, 4  ;;  %s899_s18 = int_to_ptr.vmem [resolvable:$true] %s898_s18 }
 0x737   :  { %880 = vmatpush.msra.mxu2 %v853_v62 }
 0x738   :  { %v516_v5 = vpop.f32.mrf.mxu0 }
 0x739   :  { %881 = vmatpush.msra.mxu2 %v852_v63 }
 0x73b   :  { %939 = vmatmul.msk.f32.vlgmr.msrb.gmra.mxu1 %vm175_vm5, %v687_v4  ;;  %882 = vmatpush.msra.mxu2 %v851_v0 }
 0x764   :  { %v757_v12 = vpop.f32.mrf.mxu3 }
 0x765   :  { %v758_v13 = vadd.f32 %v757_v12, %v733_v10 }
 0x767   :  { %v763_v14 = vadd.f32 %v758_v13, %v1212_v33 }
 0x769   :  { %v765_v36 = vsel %vm75_vm0, %v763_v14, 0.0 }
 0x7b0   :  { %v581_v6 = vpop.f32.mrf.mxu1  ;;  %v646_v7 = vpop.f32.mrf.mxu0 }
 0x7b1   :  { %715 = vrot.lane.b32.xlu0 %v581_v6, %s1116_s1  ;;  %719 = vrot.lane.b32.xlu2 %v646_v7, %s1112_s9 }
 0x7b8   :  { %v711_v9 = vpop.f32.mrf.mxu1 }
 0x7b9   :  { %723 = vrot.lane.b32.xlu1 %v711_v9, %s1130_s14 }
 0x7db   :  { %766 = vadd.xlane.f32.xlu0 %v765_v36 }
 0x80b   :  { %v720_v17 = vpop.permute.xlu2 %719 }
 0x823   :  { %v716_v15 = vpop.permute.xlu0 %715 }
 0x824   :  { %v726_v16 = vsel %vm175_vm5, %v516_v5, %v716_v15 }
 0x825   :  { %v727_v19 = vsel %vm445_vm9, %v726_v16, %v720_v17  ;;  %v859_v17 = vperm.slane %v1204_v26, 5 }
 0x82b   :  { %v724_v18 = vpop.permute.xlu1 %723 }
 0x82c   :  { %v728_v21 = vsel %vm447_vm10, %v727_v19, %v724_v18 }
 0x82d   :  { %941 = vmatmul.msk.f32.gmra.mxu3 %vm75_vm0, %v728_v21 }
 0x84e   :  { %v767_v22 = vpop.xlane.xlu0 %766 }
 0x84f   :  { %v771_v23 = vmul.f32 %v767_v22, %v1187_v8 }
 0x851   :  { %v773_v24 = vsub.f32 %v763_v14, %v771_v23 }
 0x853   :  { %v775_v25 = vmul.f32 %v773_v24, %v773_v24 }
 0x855   :  { %v777_v33 = vsel %vm75_vm0, %v775_v25, 0.0 }
 0x856   :  { %778 = vadd.xlane.f32.xlu1 %v777_v33 }
 0x8b0   :  { %v760_v27 = vpop.f32.mrf.mxu3 }
 0x8b1   :  { %v761_v29 = vadd.f32 %v760_v27, %v733_v10 }
 0x8b3   :  { %v764_v30 = vadd.f32 %v761_v29, %v1257_v11  ;;  %v815_v11 = vld [vmem:[%s1435_s4] sm:$0xff] }
 0x8b4   :  { %841 = vmatpush.msrb.mxu0 %v815_v11 }
 0x8b5   :  { %v768_v31 = vsel %vm75_vm0, %v764_v30, 0.0 }
 0x8b6   :  { %769 = vadd.xlane.f32.xlu2 %v768_v31 }
 0x8c9   :  { %v779_v37 = vpop.xlane.xlu1 %778 }
 0x8ca   :  { %v783_v38 = vmul.f32 %v779_v37, %v1187_v8 }
 0x8cc   :  { %v785_v39 = vadd.f32 1e-05, %v783_v38 }
 0x8ce   :  { %1005 = vrsqrt.f32 %v785_v39  ;;  %vm793_vm12 = vweird.f32 %v785_v39 }
 0x8d4   :  { %v1006_v40 = vpop.eup %1005 }
 0x8d5   :  { %v788_v41 = vmul.f32 %v1006_v40, %v785_v39  ;;  %vm794_vm11 = vweird.f32 %v1006_v40 }
 0x8d6   :  { %vm795_vm13 = vmor %vm793_vm12, %vm794_vm11 }
 0x8d7   :  { %v789_v42 = vmul.f32 %v1006_v40, %v788_v41 }
 0x8d9   :  { %v790_v43 = vmul.f32 0.5, %v789_v42 }
 0x8db   :  { %v791_v44 = vsub.f32 1.5, %v790_v43 }
 0x8dd   :  { %v792_v45 = vmul.f32 %v1006_v40, %v791_v44 }
 0x8df   :  { %v796_v47 = vsel %vm795_vm13, %v1006_v40, %v792_v45 }
 0x8e0   :  { %v807_v48 = vmul.f32 %v796_v47, %v773_v24 }
 0x8e2   :  { %v810_v51 = vmul.f32 %v809_v46, %v807_v48 }
 0x8e4   :  { %v813_v52 = vadd.f32 %v812_v50, %v810_v51 }
 0x8e6   :  { %942 = vmatmul.msk.f32.vlgmr.msrb.gmra.mxu0 %vm75_vm0, %v813_v52 }
 0x929   :  { %v770_v58 = vpop.xlane.xlu2 %769 }
 0x92a   :  { %v772_v59 = vmul.f32 %v770_v58, %v1187_v8 }
 0x92c   :  { %v774_v60 = vsub.f32 %v764_v30, %v772_v59 }
 0x92e   :  { %v776_v61 = vmul.f32 %v774_v60, %v774_v60 }
 0x930   :  { %v780_v49 = vsel %vm75_vm0, %v776_v61, 0.0 }
 0x931   :  { %781 = vadd.xlane.f32.xlu0 %v780_v49 }
 0x963   :  { %v843_v1 = vpop.f32.mrf.mxu0 }
 0x964   :  { %v844_v2 = vadd.f32 %v843_v1, %v819_v20 }
 0x966   :  { %v849_v3 = vmax.f32 %v844_v2, 0.0 }
 0x968   :  { %944 = vmatmul.msk.f32.vlgmr.msra.gmra.mxu2 %vm860_vm14, %v849_v3 }
 0x9a4   :  { %v782_v28 = vpop.xlane.xlu0 %781 }
 0x9a5   :  { %v784_v4 = vmul.f32 %v782_v28, %v1187_v8 }
 0x9a7   :  { %v786_v5 = vadd.f32 1e-05, %v784_v4 }
 0x9a9   :  { %1007 = vrsqrt.f32 %v786_v5  ;;  %vm803_vm1 = vweird.f32 %v786_v5 }
 0x9af   :  { %v1008_v6 = vpop.eup %1007 }
 0x9b0   :  { %v798_v7 = vmul.f32 %v1008_v6, %v786_v5  ;;  %vm804_vm15 = vweird.f32 %v1008_v6 }
 0x9b1   :  { %vm805_vm2 = vmor %vm803_vm1, %vm804_vm15 }
 0x9b2   :  { %v799_v9 = vmul.f32 %v1008_v6, %v798_v7 }
 0x9b4   :  { %v800_v10 = vmul.f32 0.5, %v799_v9 }
 0x9b6   :  { %v801_v12 = vsub.f32 1.5, %v800_v10 }
 0x9b8   :  { %v802_v13 = vmul.f32 %v1008_v6, %v801_v12 }
 0x9ba   :  { %v806_v14 = vsel %vm805_vm2, %v1008_v6, %v802_v13 }
 0x9bb   :  { %v808_v36 = vmul.f32 %v806_v14, %v774_v60 }
 0x9bd   :  { %v811_v15 = vmul.f32 %v809_v46, %v808_v36 }
 0x9bf   :  { %v814_v16 = vadd.f32 %v812_v50, %v811_v15 }
 0x9c1   :  { %943 = vmatmul.msk.f32.gmra.mxu0 %vm75_vm0, %v814_v16 }
 0x9eb   :  { %v884_v8 = vpop.f32.mrf.mxu2 }
 0x9ec   :  { %v885_v18 = vadd.f32 %v884_v8, %v859_v17 }
 0x9ee   :  { %v890_v19 = vadd.f32 %v885_v18, %v813_v52 }
 0x9f0   :  { %892 = vst.msk [vmem:[#allocation8] sm:$0xff] %vm75_vm0, %v890_v19 }
 0xa3e   :  { %v846_v21 = vpop.f32.mrf.mxu0 }
 0xa3f   :  { %v847_v22 = vadd.f32 %v846_v21, %v819_v20 }
 0xa41   :  { %v850_v23 = vmax.f32 %v847_v22, 0.0 }
 0xa43   :  { %945 = vmatmul.msk.f32.gmra.mxu2 %vm860_vm14, %v850_v23 }
 0xac6   :  { %v887_v24 = vpop.f32.mrf.mxu2 }
 0xac7   :  { %v888_v25 = vadd.f32 %v887_v24, %v859_v17 }
 0xac9   :  { %v891_v33 = vadd.f32 %v888_v25, %v814_v16 }
 0xacb   :  { %893 = vst.msk [vmem:[#allocation8 + $0x8] sm:$0xff] %vm75_vm0, %v891_v33 }
 0xacc   :  { %906 = dma.vmem_to_hbm [thread:$0]  %s899_s18, 256, %s901_s3, [#allocation4], %s1115_s13, %s1115_s13, %s1116_s1  }
 0xacd   :  { %1109 = dma.done.wait [#allocation4], 256  }
 0xace   :  { %1110 = vsyncadd [#allocation4], 4294967040 }
 0xacf   :  { %911 = vsyncpa [#allocation3], 1 }
 0xad0   :  { %912 = vsyncpa [#allocation6], 1 }
 0xad1   :  { %913 = vsyncpa [#allocation4], 1 }

// kernel: tpu_custom_call.1
= control target key start
LH: loop header
LB: loop body
LE: loop exit
PB: predicated region body
PF: predicated region fallthrough
CT: control target
= control target key end

     0   :  { %12 = vsyncpa [#allocation3], 0  ;;  %s1431_s0 = inlined_call_operand.hbm [shape: f32[16,32], index: 0, kind: input, shape index: {}]   ;;  %s1432_s1 = inlined_call_operand.hbm [shape: f32[2,1,8], index: 1, kind: input, shape index: {}]   ;;  %s1433_s2 = inlined_call_operand.vmem [shape: f32[32,96], index: 2, kind: input, shape index: {}]   ;;  %s1434_s3 = inlined_call_operand.vmem [shape: f32[32,32], index: 3, kind: input, shape index: {}]   ;;  %s1435_s4 = inlined_call_operand.vmem [shape: f32[32,64], index: 4, kind: input, shape index: {}]   ;;  %s1436_s5 = inlined_call_operand.vmem [shape: f32[64,32], index: 5, kind: input, shape index: {}]   ;;  %s1437_s6 = inlined_call_operand.hbm [shape: f32[8,128], index: 6, kind: input, shape index: {}]   ;;  %s1438_s7 = inlined_call_operand.hbm [shape: f32[16,32], index: 7, kind: output, shape index: {}]  }
   0x1   :  { %13 = vsyncpa [#allocation6], 0  ;;  %s32_s26 = sshll.u32 %s1432_s1, 4  ;;  %s33_s26 = int_to_ptr.hbm [resolvable:$true] %s32_s26 }
   0x2   :  { %14 = vsyncpa [#allocation4], 0  ;;  %s1111_s27 = smov [#allocation5]   ;;  %s19_s8 = sshll.u32 %s1431_s0, 4  ;;  %s20_s8 = int_to_ptr.hbm [resolvable:$true] %s19_s8 }
   0x3   :  { %s34_s28 = sshll.u32 %s1111_s27, 4  ;;  %s1112_s9 = smov 16   ;;  %s35_s28 = int_to_ptr.vmem [resolvable:$true] %s34_s28 }
   0x4   :  { %s1113_s10 = smov 1   ;;  %s1114_s11 = smov [#allocation2]  }
   0x5   :  { %40 = dma.hbm_to_vmem [thread:$0]  %s33_s26, 32, %s35_s28, [#allocation6], %s1112_s9, %s1112_s9, %s1113_s10  }
   0x6   :  { %s21_s12 = sshll.u32 %s1114_s11, 4  ;;  %s1115_s13 = smov 128   ;;  %s22_s12 = int_to_ptr.vmem [resolvable:$true] %s21_s12 }
   0x7   :  { %s1116_s1 = smov 8   ;;  %s54_s16 = sshll.u32 %s1437_s6, 4  ;;  %s55_s16 = int_to_ptr.hbm [resolvable:$true] %s54_s16 }
   0x8   :  { %27 = dma.hbm_to_vmem [thread:$0]  %s20_s8, 256, %s22_s12, [#allocation3], %s1115_s13, %s1115_s13, %s1116_s1  }
   0x9   :  { %s1117_s0 = smov [#allocation7]  }
   0xa   :  { %s56_s17 = sshll.u32 %s1117_s0, 4  ;;  %s57_s17 = int_to_ptr.vmem [resolvable:$true] %s56_s17 }
   0xb   :  { %59 = dma.hbm_to_vmem [thread:$0]  %s55_s16, 128, %s57_s17, [#allocation6]  }
   0xc   :  { %1105 = dma.done.wait [#allocation3], 256  }
   0xd   :  { %1106 = vsyncadd [#allocation3], 4294967040 }
   0xe   :  { %1107 = dma.done.wait [#allocation6], 160  }
   0xf   :  { %1108 = vsyncadd [#allocation6], 4294967136  ;;  %vm75_vm0 = vcmask 261120   ;;  %v72_v0 = vld [vmem:[#allocation2] sm:$0xff]  ;;  %v1118_v2 = vmov 32.0   ;;  %v136_v14 = vld [vmem:[%s1433_s2 + $0x18] sm:$0xff] }
  0x10   :  { %v76_v1 = vsel %vm75_vm0, %v72_v0, 0.0  ;;  %967 = vrcp.f32 %v1118_v2  ;;  %156 = vmatpush.msra.mxu0 %v136_v14  ;;  %v135_v15 = vld [vmem:[%s1433_s2 + $0x10] sm:$0xff]  ;;  %v134_v16 = vld [vmem:[%s1433_s2 + $0x8] sm:$0xff]  ;;  %v133_v17 = vld [vmem:[%s1433_s2] sm:$0xff]  ;;  %s1119_s2 = smov 120   ;;  %s1120_s25 = smov 88  }
  0x11   :  { %77 = vadd.xlane.f32.xlu0 %v76_v1  ;;  %v1204_v26 = vld [vmem:[#allocation7] sm:$0xff]  ;;  %s1121_s26 = smov 96   ;;  %s1122_s27 = smov 64   ;;  %v73_v37 = vld [vmem:[#allocation2 + $0x8] sm:$0xff]  ;;  %vm175_vm5 = vcmask 64512   ;;  %vm445_vm9 = vcmask 130048  }
  0x12   :  { %157 = vmatpush.msra.mxu0 %v135_v15  ;;  %v127_v28 = vperm.slane %v1204_v26, 0  ;;  %v130_v31 = vperm.slane %v1204_v26, 1  ;;  %v137_v34 = vperm.slane %v1204_v26, 6  ;;  %s1123_s28 = smov 80   ;;  %v79_v38 = vsel %vm75_vm0, %v73_v37, 0.0  ;;  %s1124_s29 = smov 56  }
  0x13   :  { %s1125_s30 = smov 104   ;;  %v167_v46 = vld [vmem:[#allocation5] sm:$0x1]  ;;  %s1126_s8 = smov 72   ;;  %vm447_vm10 = vcmask 195584   ;;  %vm860_vm14 = vcmask 523264  }
  0x14   :  { %158 = vmatpush.msra.mxu0 %v134_v16  ;;  %v168_v47 = vmul.f32 -1e+30, %v167_v46  ;;  %s1127_s10 = smov 112   ;;  %s1128_s11 = smov 48  }
  0x15   :  { %s1129_s12 = smov 40   ;;  %s1130_s14 = smov 24  }
  0x16   :  { %v968_v3 = vpop.eup %967  ;;  %159 = vmatpush.msra.mxu0 %v133_v17  ;;  %v1243_v49 = vperm.slane %v168_v47, 0 }
  0x17   :  { %v83_v4 = vmul.f32 32.0, %v968_v3  ;;  %vm87_vm1 = vweird.f32 %v968_v3 }
  0x19   :  { %v84_v5 = vsub.f32 1.0, %v83_v4 }
  0x1b   :  { %v85_v6 = vmul.f32 %v968_v3, %v84_v5 }
  0x1d   :  { %v86_v7 = vadd.f32 %v968_v3, %v85_v6 }
  0x1f   :  { %v1187_v8 = vsel %vm87_vm1, %v968_v3, %v86_v7 }
  0x84   :  { %v78_v9 = vpop.xlane.xlu0 %77 }
  0x85   :  { %v89_v10 = vmul.f32 %v1187_v8, %v78_v9 }
  0x87   :  { %v91_v11 = vsub.f32 %v72_v0, %v89_v10 }
  0x89   :  { %v93_v12 = vmul.f32 %v91_v11, %v91_v11 }
  0x8b   :  { %v95_v13 = vsel %vm75_vm0, %v93_v12, 0.0 }
  0x8c   :  { %96 = vadd.xlane.f32.xlu0 %v95_v13 }
  0xff   :  { %v97_v18 = vpop.xlane.xlu0 %96 }
 0x100   :  { %v101_v19 = vmul.f32 %v97_v18, %v1187_v8 }
 0x102   :  { %v103_v20 = vadd.f32 1e-05, %v101_v19 }
 0x104   :  { %969 = vrsqrt.f32 %v103_v20  ;;  %vm111_vm3 = vweird.f32 %v103_v20 }
 0x10a   :  { %v970_v21 = vpop.eup %969 }
 0x10b   :  { %v106_v22 = vmul.f32 %v970_v21, %v103_v20  ;;  %vm112_vm2 = vweird.f32 %v970_v21 }
 0x10c   :  { %vm113_vm4 = vmor %vm111_vm3, %vm112_vm2 }
 0x10d   :  { %v107_v23 = vmul.f32 %v970_v21, %v106_v22 }
 0x10f   :  { %v108_v24 = vmul.f32 0.5, %v107_v23 }
 0x111   :  { %v109_v25 = vsub.f32 1.5, %v108_v24 }
 0x113   :  { %v110_v27 = vmul.f32 %v970_v21, %v109_v25 }
 0x115   :  { %v114_v29 = vsel %vm113_vm4, %v970_v21, %v110_v27 }
 0x116   :  { %v125_v30 = vmul.f32 %v114_v29, %v91_v11 }
 0x118   :  { %v128_v32 = vmul.f32 %v127_v28, %v125_v30 }
 0x11a   :  { %v1212_v33 = vadd.f32 %v130_v31, %v128_v32 }
 0x11c   :  { %914 = vmatmul.msk.f32.vlgmr.msra.gmra.mxu0 %vm75_vm0, %v1212_v33 }
 0x199   :  { %v161_v35 = vpop.f32.mrf.mxu0 }
 0x19a   :  { %v1219_v36 = vadd.f32 %v161_v35, %v137_v34 }
 0x19c   :  { %237 = vrot.lane.b32.xlu0 %v1219_v36, %s1119_s2  ;;  %239 = vrot.lane.b32.xlu2 %v1219_v36, %s1120_s25 }
 0x19d   :  { %173 = vrot.lane.b32.xlu1 %v1219_v36, %s1121_s26 }
 0x1a4   :  { %211 = vrot.lane.b32.xlu2 %v1219_v36, %s1122_s27 }
 0x1ac   :  { %304 = vrot.lane.b32.xlu2 %v1219_v36, %s1123_s28 }
 0x1c6   :  { %80 = vadd.xlane.f32.xlu0 %v79_v38 }
 0x1da   :  { %276 = vrot.lane.b32.xlu0 %v1219_v36, %s1124_s29 }
 0x1e2   :  { %367 = vrot.lane.b32.xlu0 %v1219_v36, %s1125_s30 }
 0x1f6   :  { %v240_v39 = vpop.permute.xlu2 %239 }
 0x1f7   :  { %919 = vmatpush.xpose.msk.msra.mxu3 %vm175_vm5, %v240_v39 }
 0x1fe   :  { %v212_v40 = vpop.permute.xlu2 %211 }
 0x206   :  { %v305_v43 = vpop.permute.xlu2 %304 }
 0x20e   :  { %v238_v41 = vpop.permute.xlu0 %237 }
 0x20f   :  { %v174_v42 = vpop.permute.xlu1 %173  ;;  %920 = vmatmul.msk.f32.vlgmr.msra.gmra.mxu3 %vm175_vm5, %v238_v41 }
 0x210   :  { %916 = vmatpush.xpose.msk.msra.mxu1 %vm175_vm5, %v174_v42 }
 0x213   :  { %917 = vmatmul.msk.f32.vlgmr.msra.gmra.mxu1 %vm175_vm5, %v1219_v36 }
 0x214   :  { %232 = vmatpush.msrb.mxu1 %v212_v40 }
 0x216   :  { %922 = vmatpush.xpose.msk.msra.mxu1 %vm175_vm5, %v305_v43 }
 0x239   :  { %v81_v44 = vpop.xlane.xlu0 %80 }
 0x23a   :  { %v90_v48 = vmul.f32 %v1187_v8, %v81_v44 }
 0x23c   :  { %v92_v51 = vsub.f32 %v73_v37, %v90_v48  ;;  %v450_v48 = vld [vmem:[#allocation5 + $0x1] sm:$0x1] }
 0x23e   :  { %v94_v54 = vmul.f32 %v92_v51, %v92_v51 }
 0x240   :  { %v98_v55 = vsel %vm75_vm0, %v94_v54, 0.0 }
 0x24c   :  { %v277_v45 = vpop.permute.xlu0 %276 }
 0x24d   :  { %297 = vmatpush.msra.mxu2 %v277_v45 }
 0x254   :  { %v368_v30 = vpop.permute.xlu0 %367 }
 0x290   :  { %v197_v50 = vpop.f32.mrf.mxu1 }
 0x291   :  { %v198_v52 = vadd.f32 %v197_v50, %v1243_v49 }
 0x292   :  { %v262_v12 = vpop.f32.mrf.mxu3 }
 0x293   :  { %v200_v53 = vsel %vm175_vm5, %v198_v52, -inf  ;;  %v263_v13 = vadd.f32 %v262_v12, %v1243_v49 }
 0x294   :  { %201 = vmax.xlane.f32.xlu1 %v200_v53 }
 0x295   :  { %v265_v14 = vsel %vm175_vm5, %v263_v13, -inf }
 0x29c   :  { %99 = vadd.xlane.f32.xlu1 %v98_v55 }
 0x2b5   :  { %369 = vrot.lane.b32.xlu1 %v1219_v36, %s1126_s8 }
 0x307   :  { %v202_v56 = vpop.xlane.xlu1 %201 }
 0x308   :  { %v203_v57 = vsub.f32 %v198_v52, %v202_v56  ;;  %v451_v52 = vmul.f32 -1e+30, %v450_v48  ;;  %v731_v48 = vld [vmem:[%s1434_s3 + $0x10] sm:$0xff] }
 0x30a   :  { %v204_v58 = vmul.f32 1.442695, %v203_v57  ;;  %v1299_v54 = vperm.slane %v451_v52, 0 }
 0x30c   :  { %971 = vpow2.f32 %v204_v58 }
 0x30f   :  { %v100_v59 = vpop.xlane.xlu1 %99 }
 0x310   :  { %v102_v60 = vmul.f32 %v100_v59, %v1187_v8 }
 0x312   :  { %v972_v61 = vpop.eup %971  ;;  %v104_v62 = vadd.f32 1e-05, %v102_v60 }
 0x313   :  { %v206_v63 = vsel %vm175_vm5, %v972_v61, 0.0 }
 0x314   :  { %973 = vrsqrt.f32 %v104_v62  ;;  %207 = vadd.xlane.f32.xlu2 %v206_v63  ;;  %vm121_vm6 = vweird.f32 %v104_v62 }
 0x31a   :  { %v974_v0 = vpop.eup %973 }
 0x31b   :  { %v116_v1 = vmul.f32 %v974_v0, %v104_v62  ;;  %vm122_vm7 = vweird.f32 %v974_v0 }
 0x31c   :  { %vm123_vm8 = vmor %vm121_vm6, %vm122_vm7 }
 0x31d   :  { %v117_v2 = vmul.f32 %v974_v0, %v116_v1 }
 0x31f   :  { %v118_v3 = vmul.f32 0.5, %v117_v2 }
 0x321   :  { %v119_v4 = vsub.f32 1.5, %v118_v3 }
 0x323   :  { %v120_v5 = vmul.f32 %v974_v0, %v119_v4 }
 0x325   :  { %v124_v6 = vsel %vm123_vm8, %v974_v0, %v120_v5 }
 0x326   :  { %v126_v7 = vmul.f32 %v124_v6, %v92_v51 }
 0x327   :  { %v370_v9 = vpop.permute.xlu1 %369 }
 0x328   :  { %925 = vmatpush.xpose.msk.msrb.mxu2 %vm175_vm5, %v370_v9  ;;  %v129_v10 = vmul.f32 %v127_v28, %v126_v7 }
 0x32a   :  { %v1257_v11 = vadd.f32 %v130_v31, %v129_v10 }
 0x32c   :  { %302 = vrot.lane.b32.xlu2 %v1219_v36, %s1127_s10  ;;  %915 = vmatmul.msk.f32.gmra.mxu0 %vm75_vm0, %v1257_v11 }
 0x355   :  { %266 = vmax.xlane.f32.xlu2 %v265_v14 }
 0x36d   :  { %341 = vrot.lane.b32.xlu2 %v1219_v36, %s1128_s11 }
 0x387   :  { %v208_v15 = vpop.xlane.xlu2 %207 }
 0x388   :  { %975 = vrcp.f32 %v208_v15 }
 0x38e   :  { %v976_v16 = vpop.eup %975 }
 0x38f   :  { %v210_v17 = vmul.f32 %v976_v16, %v972_v61  ;;  %v303_v18 = vpop.permute.xlu2 %302 }
 0x391   :  { %918 = vmatmul.msk.f32.vlgmr.msrb.gmra.mxu1 %vm175_vm5, %v210_v17 }
 0x399   :  { %923 = vmatmul.msk.f32.vlgmr.msra.gmra.mxu1 %vm175_vm5, %v303_v18 }
 0x3a9   :  { %v164_v19 = vpop.f32.mrf.mxu0 }
 0x3aa   :  { %v1270_v20 = vadd.f32 %v164_v19, %v137_v34 }
 0x3ac   :  { %651 = vrot.lane.b32.xlu2 %v1270_v20, %s1126_s8  ;;  %521 = vrot.lane.b32.xlu1 %v1270_v20, %s1120_s25 }
 0x3ad   :  { %456 = vrot.lane.b32.xlu0 %v1270_v20, %s1121_s26 }
 0x3b5   :  { %519 = vrot.lane.b32.xlu0 %v1270_v20, %s1119_s2 }
 0x3bd   :  { %584 = vrot.lane.b32.xlu0 %v1270_v20, %s1127_s10 }
 0x3c8   :  { %v267_v21 = vpop.xlane.xlu2 %266 }
 0x3c9   :  { %v268_v22 = vsub.f32 %v263_v13, %v267_v21 }
 0x3cb   :  { %v269_v23 = vmul.f32 1.442695, %v268_v22 }
 0x3cd   :  { %977 = vpow2.f32 %v269_v23 }
 0x3d0   :  { %v342_v24 = vpop.permute.xlu2 %341 }
 0x3d1   :  { %362 = vmatpush.msrb.mxu3 %v342_v24 }
 0x3d3   :  { %v978_v25 = vpop.eup %977 }
 0x3d4   :  { %v271_v27 = vsel %vm175_vm5, %v978_v25, 0.0 }
 0x3d6   :  { %272 = vadd.xlane.f32.xlu1 %v271_v27 }
 0x406   :  { %v652_v40 = vpop.permute.xlu2 %651 }
 0x40e   :  { %v1282_v28 = vpop.f32.mrf.mxu1 }
 0x416   :  { %v327_v29 = vpop.f32.mrf.mxu1 }
 0x417   :  { %v328_v31 = vadd.f32 %v327_v29, %v1243_v49 }
 0x419   :  { %v330_v32 = vsel %vm175_vm5, %v328_v31, -inf }
 0x41a   :  { %331 = vmax.xlane.f32.xlu1 %v330_v32 }
 0x41e   :  { %v522_v35 = vpop.permute.xlu1 %521 }
 0x41f   :  { %v457_v34 = vpop.permute.xlu0 %456 }
 0x420   :  { %928 = vmatpush.xpose.msk.msra.mxu3 %vm175_vm5, %v457_v34 }
 0x427   :  { %v520_v41 = vpop.permute.xlu0 %519 }
 0x42f   :  { %v585_v62 = vpop.permute.xlu0 %584 }
 0x433   :  { %586 = vrot.lane.b32.xlu1 %v1270_v20, %s1123_s28 }
 0x449   :  { %v273_v37 = vpop.xlane.xlu1 %272 }
 0x44a   :  { %979 = vrcp.f32 %v273_v37 }
 0x450   :  { %v980_v38 = vpop.eup %979 }
 0x451   :  { %v275_v39 = vmul.f32 %v980_v38, %v978_v25 }
 0x453   :  { %921 = vmatmul.msk.f32.vlgmr.msra.gmra.mxu2 %vm175_vm5, %v275_v39 }
 0x454   :  { %931 = vmatpush.xpose.msk.msra.mxu2 %vm175_vm5, %v522_v35 }
 0x45b   :  { %926 = vmatmul.msk.f32.vlgmr.msrb.gmra.mxu2 %vm175_vm5, %v368_v30 }
 0x45c   :  { %937 = vmatpush.xpose.msk.msrb.mxu2 %vm175_vm5, %v652_v40 }
 0x463   :  { %932 = vmatmul.msk.f32.vlgmr.msra.gmra.mxu2 %vm175_vm5, %v520_v41 }
 0x48d   :  { %v332_v42 = vpop.xlane.xlu1 %331 }
 0x48e   :  { %v333_v43 = vsub.f32 %v328_v31, %v332_v42 }
 0x490   :  { %v334_v44 = vmul.f32 1.442695, %v333_v43 }
 0x492   :  { %981 = vpow2.f32 %v334_v44 }
 0x498   :  { %v982_v45 = vpop.eup %981 }
 0x499   :  { %v336_v46 = vsel %vm175_vm5, %v982_v45, 0.0 }
 0x49a   :  { %337 = vadd.xlane.f32.xlu1 %v336_v46 }
 0x4a5   :  { %v587_v58 = vpop.permute.xlu1 %586 }
 0x4b3   :  { %649 = vrot.lane.b32.xlu1 %v1270_v20, %s1125_s30 }
 0x4d6   :  { %v299_v47 = vpop.f32.mrf.mxu2 }
 0x4de   :  { %v392_v50 = vpop.f32.mrf.mxu2 }
 0x4df   :  { %v393_v51 = vadd.f32 %v392_v50, %v1243_v49  ;;  %v730_v50 = vld [vmem:[%s1434_s3 + $0x8] sm:$0xff] }
 0x4e1   :  { %v395_v53 = vsel %vm175_vm5, %v393_v51, -inf }
 0x4e2   :  { %396 = vmax.xlane.f32.xlu2 %v395_v53 }
 0x4e6   :  { %v544_v55 = vpop.f32.mrf.mxu2 }
 0x4e7   :  { %v545_v56 = vadd.f32 %v544_v55, %v1299_v54 }
 0x4e9   :  { %v547_v57 = vsel %vm175_vm5, %v545_v56, -inf }
 0x4ea   :  { %548 = vmax.xlane.f32.xlu1 %v547_v57 }
 0x50d   :  { %v338_v59 = vpop.xlane.xlu1 %337 }
 0x50e   :  { %983 = vrcp.f32 %v338_v59 }
 0x514   :  { %v984_v60 = vpop.eup %983 }
 0x515   :  { %v340_v61 = vmul.f32 %v984_v60, %v982_v45 }
 0x517   :  { %924 = vmatmul.msk.f32.vlgmr.msrb.gmra.mxu3 %vm175_vm5, %v340_v61 }
 0x518   :  { %934 = vmatpush.xpose.msk.msrb.mxu3 %vm175_vm5, %v587_v58 }
 0x51f   :  { %929 = vmatmul.msk.f32.vlgmr.msra.gmra.mxu3 %vm175_vm5, %v1270_v20 }
 0x525   :  { %v650_v49 = vpop.permute.xlu1 %649 }
 0x526   :  { %938 = vmatmul.msk.f32.vlgmr.msrb.gmra.mxu2 %vm175_vm5, %v650_v49 }
 0x527   :  { %935 = vmatmul.msk.f32.vlgmr.msrb.gmra.mxu3 %vm175_vm5, %v585_v62 }
 0x555   :  { %v397_v63 = vpop.xlane.xlu2 %396 }
 0x556   :  { %v398_v0 = vsub.f32 %v393_v51, %v397_v63 }
 0x558   :  { %v399_v1 = vmul.f32 1.442695, %v398_v0 }
 0x55a   :  { %985 = vpow2.f32 %v399_v1 }
 0x55d   :  { %v549_v5 = vpop.xlane.xlu1 %548 }
 0x55e   :  { %v550_v9 = vsub.f32 %v545_v56, %v549_v5  ;;  %v729_v56 = vld [vmem:[%s1434_s3] sm:$0xff] }
 0x560   :  { %v986_v2 = vpop.eup %985  ;;  %v551_v12 = vmul.f32 1.442695, %v550_v9 }
 0x561   :  { %v401_v3 = vsel %vm175_vm5, %v986_v2, 0.0 }
 0x562   :  { %402 = vadd.xlane.f32.xlu1 %v401_v3  ;;  %987 = vpow2.f32 %v551_v12 }
 0x568   :  { %v1318_v15 = vpop.eup %987 }
 0x569   :  { %v553_v16 = vsel %vm175_vm5, %v1318_v15, 0.0 }
 0x57b   :  { %406 = vrot.lane.b32.xlu1 %v1219_v36, %s1129_s12 }
 0x583   :  { %623 = vrot.lane.b32.xlu1 %v1270_v20, %s1128_s11 }
 0x58b   :  { %433 = vrot.lane.b32.xlu1 %v299_v47, %s1116_s1  ;;  %v732_v47 = vld [vmem:[%s1434_s3 + $0x18] sm:$0xff]  ;;  %s900_s3 = sshll.u32 %s1438_s7, 4  ;;  %s901_s3 = int_to_ptr.hbm [resolvable:$true] %s900_s3 }
 0x58c   :  { %752 = vmatpush.msra.mxu3 %v732_v47 }
 0x58e   :  { %753 = vmatpush.msra.mxu3 %v731_v48 }
 0x590   :  { %754 = vmatpush.msra.mxu3 %v730_v50  ;;  %v812_v50 = vperm.slane %v1204_v26, 3 }
 0x592   :  { %755 = vmatpush.msra.mxu3 %v729_v56  ;;  %v855_v56 = vld [vmem:[%s1436_s5 + $0x20] sm:$0xff] }
 0x59a   :  { %v364_v4 = vpop.f32.mrf.mxu3 }
 0x5a2   :  { %v479_v6 = vpop.f32.mrf.mxu3 }
 0x5a3   :  { %v480_v7 = vadd.f32 %v479_v6, %v1299_v54 }
 0x5a5   :  { %v482_v10 = vsel %vm175_vm5, %v480_v7, -inf }
 0x5a6   :  { %483 = vmax.xlane.f32.xlu0 %v482_v10  ;;  %v733_v10 = vperm.slane %v1204_v26, 4 }
 0x5a9   :  { %v674_v13 = vpop.f32.mrf.mxu2 }
 0x5aa   :  { %v675_v14 = vadd.f32 %v674_v13, %v1299_v54  ;;  %v609_v31 = vpop.f32.mrf.mxu3 }
 0x5ab   :  { %v610_v34 = vadd.f32 %v609_v31, %v1299_v54 }
 0x5ac   :  { %v677_v36 = vsel %vm175_vm5, %v675_v14, -inf }
 0x5ad   :  { %v612_v37 = vsel %vm175_vm5, %v610_v34, -inf }
 0x5ae   :  { %678 = vmax.xlane.f32.xlu0 %v677_v36 }
 0x5b6   :  { %554 = vadd.xlane.f32.xlu0 %v553_v16 }
 0x5ca   :  { %493 = vrot.lane.b32.xlu0 %v1270_v20, %s1122_s27 }
 0x5d2   :  { %688 = vrot.lane.b32.xlu0 %v1270_v20, %s1129_s12 }
 0x5d5   :  { %v403_v17 = vpop.xlane.xlu1 %402 }
 0x5d6   :  { %989 = vrcp.f32 %v403_v17 }
 0x5da   :  { %437 = vrot.lane.b32.xlu0 %v364_v4, %s1112_s9 }
 0x5dc   :  { %v990_v18 = vpop.eup %989 }
 0x5dd   :  { %v405_v19 = vmul.f32 %v990_v18, %v986_v2 }
 0x5ed   :  { %v407_v21 = vpop.permute.xlu1 %406 }
 0x5ee   :  { %427 = vmatpush.msrb.mxu1 %v407_v21 }
 0x5ef   :  { %927 = vmatmul.msk.f32.vlgmr.msrb.gmra.mxu1 %vm175_vm5, %v405_v19 }
 0x5f5   :  { %v624_v40 = vpop.permute.xlu1 %623 }
 0x5fd   :  { %v434_v58 = vpop.permute.xlu1 %433 }
 0x5fe   :  { %v444_v60 = vsel %vm175_vm5, %v1282_v28, %v434_v58 }
 0x619   :  { %v484_v22 = vpop.xlane.xlu0 %483 }
 0x61a   :  { %v485_v29 = vsub.f32 %v480_v7, %v484_v22 }
 0x61c   :  { %v486_v32 = vmul.f32 1.442695, %v485_v29 }
 0x621   :  { %v679_v23 = vpop.xlane.xlu0 %678 }
 0x622   :  { %v680_v24 = vsub.f32 %v675_v14, %v679_v23 }
 0x624   :  { %v681_v25 = vmul.f32 1.442695, %v680_v24 }
 0x626   :  { %991 = vpow2.f32 %v681_v25 }
 0x627   :  { %993 = vpow2.f32 %v486_v32  ;;  %v818_v32 = vld [vmem:[%s1435_s4 + $0x18] sm:$0xff] }
 0x629   :  { %v555_v35 = vpop.xlane.xlu0 %554 }
 0x62c   :  { %v1327_v27 = vpop.eup %991 }
 0x62d   :  { %v683_v30 = vsel %vm175_vm5, %v1327_v27, 0.0  ;;  %v994_v38 = vpop.eup %993 }
 0x62e   :  { %684 = vadd.xlane.f32.xlu2 %v683_v30  ;;  %v488_v41 = vsel %vm175_vm5, %v994_v38, 0.0 }
 0x636   :  { %613 = vmax.xlane.f32.xlu2 %v612_v37 }
 0x63c   :  { %v494_v39 = vpop.permute.xlu0 %493 }
 0x63d   :  { %514 = vmatpush.msrb.mxu0 %v494_v39 }
 0x63e   :  { %489 = vadd.xlane.f32.xlu2 %v488_v41 }
 0x63f   :  { %644 = vmatpush.msra.mxu0 %v624_v40 }
 0x644   :  { %v689_v57 = vpop.permute.xlu0 %688 }
 0x64c   :  { %v438_v59 = vpop.permute.xlu0 %437 }
 0x64d   :  { %v446_v61 = vsel %vm445_vm9, %v444_v60, %v438_v59 }
 0x66c   :  { %v429_v42 = vpop.f32.mrf.mxu1 }
 0x66d   :  { %441 = vrot.lane.b32.xlu1 %v429_v42, %s1130_s14 }
 0x6a1   :  { %v685_v43 = vpop.xlane.xlu2 %684 }
 0x6a9   :  { %v614_v44 = vpop.xlane.xlu2 %613 }
 0x6aa   :  { %v615_v45 = vsub.f32 %v610_v34, %v614_v44  ;;  %v817_v34 = vld [vmem:[%s1435_s4 + $0x10] sm:$0xff] }
 0x6ac   :  { %v616_v46 = vmul.f32 1.442695, %v615_v45 }
 0x6ae   :  { %995 = vpow2.f32 %v616_v46  ;;  %v809_v46 = vperm.slane %v1204_v26, 2 }
 0x6b1   :  { %v490_v51 = vpop.xlane.xlu2 %489 }
 0x6b2   :  { %997 = vrcp.f32 %v490_v51 }
 0x6b3   :  { %999 = vrcp.f32 %v555_v35  ;;  %v816_v35 = vld [vmem:[%s1435_s4 + $0x8] sm:$0xff] }
 0x6b4   :  { %v996_v52 = vpop.eup %995 }
 0x6b5   :  { %v618_v53 = vsel %vm175_vm5, %v996_v52, 0.0 }
 0x6b6   :  { %619 = vadd.xlane.f32.xlu2 %v618_v53  ;;  %v858_v53 = vld [vmem:[%s1436_s5 + $0x38] sm:$0xff] }
 0x6b7   :  { %875 = vmatpush.msra.mxu2 %v858_v53 }
 0x6b8   :  { %v998_v54 = vpop.eup %997 }
 0x6b9   :  { %v492_v55 = vmul.f32 %v998_v54, %v994_v38  ;;  %v1000_v0 = vpop.eup %999  ;;  %v857_v54 = vld [vmem:[%s1436_s5 + $0x30] sm:$0xff] }
 0x6ba   :  { %v557_v1 = vmul.f32 %v1000_v0, %v1318_v15  ;;  %876 = vmatpush.msra.mxu2 %v857_v54  ;;  %v851_v0 = vld [vmem:[%s1436_s5] sm:$0xff] }
 0x6bb   :  { %930 = vmatmul.msk.f32.vlgmr.msrb.gmra.mxu0 %vm175_vm5, %v492_v55  ;;  %v856_v55 = vld [vmem:[%s1436_s5 + $0x28] sm:$0xff] }
 0x6bc   :  { %838 = vmatpush.msrb.mxu0 %v818_v32  ;;  %877 = vmatpush.msra.mxu2 %v856_v55 }
 0x6be   :  { %839 = vmatpush.msrb.mxu0 %v817_v34  ;;  %878 = vmatpush.msra.mxu2 %v855_v56 }
 0x6c0   :  { %840 = vmatpush.msrb.mxu0 %v816_v35 }
 0x6ce   :  { %558 = vrot.lane.b32.xlu2 %v1270_v20, %s1124_s29 }
 0x6df   :  { %v442_v49 = vpop.permute.xlu1 %441 }
 0x6e0   :  { %v448_v62 = vsel %vm447_vm10, %v446_v61, %v442_v49 }
 0x6e1   :  { %940 = vmatmul.msk.f32.vlgmr.msra.gmra.mxu3 %vm75_vm0, %v448_v62  ;;  %v853_v62 = vld [vmem:[%s1436_s5 + $0x10] sm:$0xff] }
 0x729   :  { %v620_v63 = vpop.xlane.xlu2 %619 }
 0x72a   :  { %1001 = vrcp.f32 %v620_v63  ;;  %v852_v63 = vld [vmem:[%s1436_s5 + $0x8] sm:$0xff] }
 0x72b   :  { %1003 = vrcp.f32 %v685_v43 }
 0x730   :  { %v1002_v20 = vpop.eup %1001 }
 0x731   :  { %v622_v2 = vmul.f32 %v1002_v20, %v996_v52  ;;  %v559_v3 = vpop.permute.xlu2 %558  ;;  %v1004_v28 = vpop.eup %1003  ;;  %v819_v20 = vperm.slane %v1204_v26, 7 }
 0x732   :  { %579 = vmatpush.msra.mxu1 %v559_v3  ;;  %v687_v4 = vmul.f32 %v1004_v28, %v1327_v27 }
 0x733   :  { %933 = vmatmul.msk.f32.vlgmr.msra.gmra.mxu1 %vm175_vm5, %v557_v1  ;;  %936 = vmatmul.msk.f32.vlgmr.msra.gmra.mxu0 %vm175_vm5, %v622_v2 }
 0x734   :  { %709 = vmatpush.msrb.mxu1 %v689_v57  ;;  %v854_v57 = vld [vmem:[%s1436_s5 + $0x18] sm:$0xff]  ;;  %s1131_s5 = smov [#allocation8]  }
 0x735   :  { %879 = vmatpush.msra.mxu2 %v854_v57  ;;  %s898_s18 = sshll.u32 %s1131_s5, 4  ;;  %s899_s18 = int_to_ptr.vmem [resolvable:$true] %s898_s18 }
 0x737   :  { %880 = vmatpush.msra.mxu2 %v853_v62 }
 0x738   :  { %v516_v5 = vpop.f32.mrf.mxu0 }
 0x739   :  { %881 = vmatpush.msra.mxu2 %v852_v63 }
 0x73b   :  { %939 = vmatmul.msk.f32.vlgmr.msrb.gmra.mxu1 %vm175_vm5, %v687_v4  ;;  %882 = vmatpush.msra.mxu2 %v851_v0 }
 0x764   :  { %v757_v12 = vpop.f32.mrf.mxu3 }
 0x765   :  { %v758_v13 = vadd.f32 %v757_v12, %v733_v10 }
 0x767   :  { %v763_v14 = vadd.f32 %v758_v13, %v1212_v33 }
 0x769   :  { %v765_v36 = vsel %vm75_vm0, %v763_v14, 0.0 }
 0x7b0   :  { %v581_v6 = vpop.f32.mrf.mxu1  ;;  %v646_v7 = vpop.f32.mrf.mxu0 }
 0x7b1   :  { %715 = vrot.lane.b32.xlu0 %v581_v6, %s1116_s1  ;;  %719 = vrot.lane.b32.xlu2 %v646_v7, %s1112_s9 }
 0x7b8   :  { %v711_v9 = vpop.f32.mrf.mxu1 }
 0x7b9   :  { %723 = vrot.lane.b32.xlu1 %v711_v9, %s1130_s14 }
 0x7db   :  { %766 = vadd.xlane.f32.xlu0 %v765_v36 }
 0x80b   :  { %v720_v17 = vpop.permute.xlu2 %719 }
 0x823   :  { %v716_v15 = vpop.permute.xlu0 %715 }
 0x824   :  { %v726_v16 = vsel %vm175_vm5, %v516_v5, %v716_v15 }
 0x825   :  { %v727_v19 = vsel %vm445_vm9, %v726_v16, %v720_v17  ;;  %v859_v17 = vperm.slane %v1204_v26, 5 }
 0x82b   :  { %v724_v18 = vpop.permute.xlu1 %723 }
 0x82c   :  { %v728_v21 = vsel %vm447_vm10, %v727_v19, %v724_v18 }
 0x82d   :  { %941 = vmatmul.msk.f32.gmra.mxu3 %vm75_vm0, %v728_v21 }
 0x84e   :  { %v767_v22 = vpop.xlane.xlu0 %766 }
 0x84f   :  { %v771_v23 = vmul.f32 %v767_v22, %v1187_v8 }
 0x851   :  { %v773_v24 = vsub.f32 %v763_v14, %v771_v23 }
 0x853   :  { %v775_v25 = vmul.f32 %v773_v24, %v773_v24 }
 0x855   :  { %v777_v33 = vsel %vm75_vm0, %v775_v25, 0.0 }
 0x856   :  { %778 = vadd.xlane.f32.xlu1 %v777_v33 }
 0x8b0   :  { %v760_v27 = vpop.f32.mrf.mxu3 }
 0x8b1   :  { %v761_v29 = vadd.f32 %v760_v27, %v733_v10 }
 0x8b3   :  { %v764_v30 = vadd.f32 %v761_v29, %v1257_v11  ;;  %v815_v11 = vld [vmem:[%s1435_s4] sm:$0xff] }
 0x8b4   :  { %841 = vmatpush.msrb.mxu0 %v815_v11 }
 0x8b5   :  { %v768_v31 = vsel %vm75_vm0, %v764_v30, 0.0 }
 0x8b6   :  { %769 = vadd.xlane.f32.xlu2 %v768_v31 }
 0x8c9   :  { %v779_v37 = vpop.xlane.xlu1 %778 }
 0x8ca   :  { %v783_v38 = vmul.f32 %v779_v37, %v1187_v8 }
 0x8cc   :  { %v785_v39 = vadd.f32 1e-05, %v783_v38 }
 0x8ce   :  { %1005 = vrsqrt.f32 %v785_v39  ;;  %vm793_vm12 = vweird.f32 %v785_v39 }
 0x8d4   :  { %v1006_v40 = vpop.eup %1005 }
 0x8d5   :  { %v788_v41 = vmul.f32 %v1006_v40, %v785_v39  ;;  %vm794_vm11 = vweird.f32 %v1006_v40 }
 0x8d6   :  { %vm795_vm13 = vmor %vm793_vm12, %vm794_vm11 }
 0x8d7   :  { %v789_v42 = vmul.f32 %v1006_v40, %v788_v41 }
 0x8d9   :  { %v790_v43 = vmul.f32 0.5, %v789_v42 }
 0x8db   :  { %v791_v44 = vsub.f32 1.5, %v790_v43 }
 0x8dd   :  { %v792_v45 = vmul.f32 %v1006_v40, %v791_v44 }
 0x8df   :  { %v796_v47 = vsel %vm795_vm13, %v1006_v40, %v792_v45 }
 0x8e0   :  { %v807_v48 = vmul.f32 %v796_v47, %v773_v24 }
 0x8e2   :  { %v810_v51 = vmul.f32 %v809_v46, %v807_v48 }
 0x8e4   :  { %v813_v52 = vadd.f32 %v812_v50, %v810_v51 }
 0x8e6   :  { %942 = vmatmul.msk.f32.vlgmr.msrb.gmra.mxu0 %vm75_vm0, %v813_v52 }
 0x929   :  { %v770_v58 = vpop.xlane.xlu2 %769 }
 0x92a   :  { %v772_v59 = vmul.f32 %v770_v58, %v1187_v8 }
 0x92c   :  { %v774_v60 = vsub.f32 %v764_v30, %v772_v59 }
 0x92e   :  { %v776_v61 = vmul.f32 %v774_v60, %v774_v60 }
 0x930   :  { %v780_v49 = vsel %vm75_vm0, %v776_v61, 0.0 }
 0x931   :  { %781 = vadd.xlane.f32.xlu0 %v780_v49 }
 0x963   :  { %v843_v1 = vpop.f32.mrf.mxu0 }
 0x964   :  { %v844_v2 = vadd.f32 %v843_v1, %v819_v20 }
 0x966   :  { %v849_v3 = vmax.f32 %v844_v2, 0.0 }
 0x968   :  { %944 = vmatmul.msk.f32.vlgmr.msra.gmra.mxu2 %vm860_vm14, %v849_v3 }
 0x9a4   :  { %v782_v28 = vpop.xlane.xlu0 %781 }
 0x9a5   :  { %v784_v4 = vmul.f32 %v782_v28, %v1187_v8 }
 0x9a7   :  { %v786_v5 = vadd.f32 1e-05, %v784_v4 }
 0x9a9   :  { %1007 = vrsqrt.f32 %v786_v5  ;;  %vm803_vm1 = vweird.f32 %v786_v5 }
 0x9af   :  { %v1008_v6 = vpop.eup %1007 }
 0x9b0   :  { %v798_v7 = vmul.f32 %v1008_v6, %v786_v5  ;;  %vm804_vm15 = vweird.f32 %v1008_v6 }
 0x9b1   :  { %vm805_vm2 = vmor %vm803_vm1, %vm804_vm15 }
 0x9b2   :  { %v799_v9 = vmul.f32 %v1008_v6, %v798_v7 }
 0x9b4   :  { %v800_v10 = vmul.f32 0.5, %v799_v9 }
 0x9b6   :  { %v801_v12 = vsub.f32 1.5, %v800_v10 }
 0x9b8   :  { %v802_v13 = vmul.f32 %v1008_v6, %v801_v12 }
 0x9ba   :  { %v806_v14 = vsel %vm805_vm2, %v1008_v6, %v802_v13 }
 0x9bb   :  { %v808_v36 = vmul.f32 %v806_v14, %v774_v60 }
 0x9bd   :  { %v811_v15 = vmul.f32 %v809_v46, %v808_v36 }
 0x9bf   :  { %v814_v16 = vadd.f32 %v812_v50, %v811_v15 }
 0x9c1   :  { %943 = vmatmul.msk.f32.gmra.mxu0 %vm75_vm0, %v814_v16 }
 0x9eb   :  { %v884_v8 = vpop.f32.mrf.mxu2 }
 0x9ec   :  { %v885_v18 = vadd.f32 %v884_v8, %v859_v17 }
 0x9ee   :  { %v890_v19 = vadd.f32 %v885_v18, %v813_v52 }
 0x9f0   :  { %892 = vst.msk [vmem:[#allocation8] sm:$0xff] %vm75_vm0, %v890_v19 }
 0xa3e   :  { %v846_v21 = vpop.f32.mrf.mxu0 }
 0xa3f   :  { %v847_v22 = vadd.f32 %v846_v21, %v819_v20 }
 0xa41   :  { %v850_v23 = vmax.f32 %v847_v22, 0.0 }
 0xa43   :  { %945 = vmatmul.msk.f32.gmra.mxu2 %vm860_vm14, %v850_v23 }
 0xac6   :  { %v887_v24 = vpop.f32.mrf.mxu2 }
 0xac7   :  { %v888_v25 = vadd.f32 %v887_v24, %v859_v17 }
 0xac9   :  { %v891_v33 = vadd.f32 %v888_v25, %v814_v16 }
 0xacb   :  { %893 = vst.msk [vmem:[#allocation8 + $0x8] sm:$0xff] %vm75_vm0, %v891_v33 }
 0xacc   :  { %906 = dma.vmem_to_hbm [thread:$0]  %s899_s18, 256, %s901_s3, [#allocation4], %s1115_s13, %s1115_s13, %s1116_s1  }
 0xacd   :  { %1109 = dma.done.wait [#allocation4], 256  }
 0xace   :  { %1110 = vsyncadd [#allocation4], 4294967040 }
 0xacf   :  { %911 = vsyncpa [#allocation3], 1 }
 0xad0   :  { %912 = vsyncpa [#allocation6], 1 }
 0xad1   :  { %913 = vsyncpa [#allocation4], 1 }

</bundles_post_ra>
